<compile_context>
chip_gen: v5e
topology: v5e:2x2
jax: 0.10.0
libtpu: 0.0.40
codegen_flags: <defaults>
</compile_context>

<pallas_src>
import functools

import jax
import jax.numpy as jnp
from jax.experimental import pallas as pl
from jax.experimental.pallas import tpu as pltpu


def _rope_kernel(inv_freq_ref, cosd_ref, sind_ref, cos_ref, sin_ref, *,
                 row_block, dim_c, half):
    # Base angle for this tile's first row: row0 * theta_j  (shape (1, dim_c)).
    row0_f = (pl.program_id(0) * row_block).astype(jnp.float32)
    base = row0_f * inv_freq_ref[...]
    cos_b = jnp.cos(base)                      # only dim_c transcendentals per tile
    sin_b = jnp.sin(base)

    # Angle addition:  angle(row0 + r) = base + delta(r)
    cos_t = (cos_b * cosd_ref[...] - sin_b * sind_ref[...]).astype(cos_ref.dtype)
    sin_t = (sin_b * cosd_ref[...] + cos_b * sind_ref[...]).astype(sin_ref.dtype)

    if half:
        # emb = cat([freqs, freqs], -1): both halves are identical.
        cos_ref[:, :dim_c] = cos_t
        cos_ref[:, dim_c:] = cos_t
        sin_ref[:, :dim_c] = sin_t
        sin_ref[:, dim_c:] = sin_t
    else:
        cos_ref[...] = cos_t
        sin_ref[...] = sin_t


def _round_up(x, m):
    return ((x + m - 1) // m) * m


def _choose_row_block(seq_len, dim, dim_c, out_itemsize):
    # VMEM per tile row: double-buffered cos+sin output tiles plus the (also
    # double-buffered) f32 delta tables.  Budget 10 MiB so the total stays well
    # under v5e's 16 MiB scoped-VMEM default (v6e/v7x have 32 MiB).
    budget = 10 * 1024 * 1024
    per_row = 4 * dim * out_itemsize + 16 * dim_c
    rb = budget // max(per_row, 1)
    rb = int(max(16, min(rb, 1024)))
    if seq_len > 256:
        # Ensure >= 4 grid steps for long sequences so v7x can shard the grid
        # across both TensorCores and the pipeline has depth.
        rb = min(rb, max(64, _round_up(-(-seq_len // 4), 16)))
    if seq_len >= 16:
        # Never make the block taller than the output (last block stays a normal
        # partial block instead of block_shape > array_shape).
        rb = min(rb, (seq_len // 16) * 16)
    rb = max(16, (rb // 16) * 16)               # sublane-aligned for f32 and bf16
    return rb


def rotary_embedding(x, dim, *, base=10000.0, seq_len=None):
    """Pallas equivalent of TransformerRotaryEmbedding.forward(x, seq_len).

    Returns (cos, sin), each of shape [seq_len, dim] with dtype == x.dtype.
    """
    assert dim % 2 == 0, "rotary dim must be even"
    if seq_len is None:
        seq_len = x.shape[-2]
    seq_len = int(seq_len)
    out_dtype = x.dtype

    # Compute on half the lanes only when both halves stay lane-dense.
    half = (dim >= 256) and ((dim // 2) % 128 == 0)
    dim_c = dim // 2 if half else dim

    inv_freq = 1.0 / (base ** (jnp.arange(0, dim, 2, dtype=jnp.float32) / dim))
    if half:
        inv_freq_c = inv_freq.reshape(1, dim_c)
    else:
        inv_freq_c = jnp.concatenate([inv_freq, inv_freq]).reshape(1, dim)

    itemsize = jnp.dtype(out_dtype).itemsize
    row_block = _choose_row_block(seq_len, dim, dim_c, itemsize)

    # Tiny pad only for seq_len < 16; otherwise the output shape is exact and the
    # last block is simply partial (no pad-then-slice extra HBM pass).
    out_rows = row_block if seq_len < 16 else seq_len
    grid = (pl.cdiv(out_rows, row_block),)

    # One-time delta tables for the angle-addition identity (f32, row_block rows).
    r = jnp.arange(row_block, dtype=jnp.float32).reshape(row_block, 1)
    delta = r * inv_freq_c                       # (row_block, dim_c)
    cos_d = jnp.cos(delta)
    sin_d = jnp.sin(delta)

    need = (2 * 2 * row_block * dim * itemsize          # cos+sin out tiles, double-buffered
            + 2 * 2 * row_block * dim_c * 4             # delta tables, double-buffered
            + 2 * dim_c * 4 + (1 << 20))                # inv_freq + slack
    vmem_limit = int(min(max(need, 16 << 20), 32 << 20))

    kernel = functools.partial(_rope_kernel, row_block=row_block, dim_c=dim_c, half=half)

    cos, sin = pl.pallas_call(
        kernel,
        out_shape=(
            jax.ShapeDtypeStruct((out_rows, dim), out_dtype),
            jax.ShapeDtypeStruct((out_rows, dim), out_dtype),
        ),
        grid_spec=pltpu.PrefetchScalarGridSpec(
            num_scalar_prefetch=0,
            grid=grid,
            in_specs=[
                # Tiny constant tables; same block every step (fetched once).
                pl.BlockSpec((1, dim_c), lambda i: (0, 0)),
                pl.BlockSpec((row_block, dim_c), lambda i: (0, 0)),
                pl.BlockSpec((row_block, dim_c), lambda i: (0, 0)),
            ],
            out_specs=[
                pl.BlockSpec((row_block, dim), lambda i: (i, 0)),
                pl.BlockSpec((row_block, dim), lambda i: (i, 0)),
            ],
        ),
        compiler_params=pltpu.CompilerParams(
            dimension_semantics=("parallel",),
            vmem_limit_bytes=vmem_limit,
        ),
    )(inv_freq_c, cos_d, sin_d)

    if out_rows != seq_len:
        cos = cos[:seq_len]
        sin = sin[:seq_len]
    return cos, sin


def rope_reference(x, dim, base=10000.0, seq_len=None):
    """Pure-JAX reference mirroring the PyTorch module exactly."""
    if seq_len is None:
        seq_len = x.shape[-2]
    inv_freq = 1.0 / (base ** (jnp.arange(0, dim, 2, dtype=jnp.float32) / dim))
    t = jnp.arange(seq_len, dtype=jnp.float32)
    freqs = jnp.einsum("i,j->ij", t, inv_freq)
    emb = jnp.concatenate([freqs, freqs], axis=-1)
    return jnp.cos(emb).astype(x.dtype), jnp.sin(emb).astype(x.dtype)


if __name__ == "__main__":
    key = jax.random.PRNGKey(0)
    batch, seq, dim = 2, 8, 128

    # forward(x) only uses x.shape[-2] (seq_len) and x.dtype.
    x = jax.random.normal(key, (batch, seq, dim), dtype=jnp.float32)

    cos, sin = jax.block_until_ready(rotary_embedding(x, dim, base=10000.0))
    cos_ref, sin_ref = rope_reference(x, dim, base=10000.0)

    assert cos.shape == (seq, dim) and sin.shape == (seq, dim)
    assert cos.dtype == x.dtype and sin.dtype == x.dtype
    assert jnp.allclose(cos, cos_ref, atol=1e-5, rtol=1e-5), "cos mismatch vs reference"
    assert jnp.allclose(sin, sin_ref, atol=1e-5, rtol=1e-5), "sin mismatch vs reference"

    # bf16 path: output dtype follows x.dtype (matches `.to(dtype=x.dtype)`).
    xb = x.astype(jnp.bfloat16)
    cos_b, sin_b = jax.block_until_ready(rotary_embedding(xb, dim, base=10000.0))
    cos_br, sin_br = rope_reference(xb, dim, base=10000.0)
    assert cos_b.dtype == jnp.bfloat16 and sin_b.dtype == jnp.bfloat16
    assert jnp.allclose(cos_b.astype(jnp.float32), cos_br.astype(jnp.float32),
                        atol=1e-2, rtol=1e-2)
    assert jnp.allclose(sin_b.astype(jnp.float32), sin_br.astype(jnp.float32),
                        atol=1e-2, rtol=1e-2)

    # Explicit seq_len path: multiple grid steps, ragged last block, nonzero base
    # angles (exercises the angle-addition identity).  Tolerance accounts for the
    # ~1-2 ULP extra error of the product form plus f32 argument rounding.
    seq2 = 200
    cos2, sin2 = jax.block_until_ready(rotary_embedding(x, dim, base=10000.0, seq_len=seq2))
    cos2_ref, sin2_ref = rope_reference(x, dim, base=10000.0, seq_len=seq2)
    assert cos2.shape == (seq2, dim) and sin2.shape == (seq2, dim)
    assert jnp.allclose(cos2, cos2_ref, atol=2e-4, rtol=0), "cos mismatch (seq_len=200)"
    assert jnp.allclose(sin2, sin2_ref, atol=2e-4, rtol=0), "sin mismatch (seq_len=200)"

    print("KERNEL_OK")
</pallas_src>

<mosaic_0001>
module attributes {stable_mosaic.version = 11 : i64} {
  func.func @_rope_kernel(%arg0: i32, %arg1: memref<1x128xf32, #tpu.memory_space<vmem>>, %arg2: memref<1024x128xf32, #tpu.memory_space<vmem>>, %arg3: memref<1024x128xf32, #tpu.memory_space<vmem>>, %arg4: memref<1024x128xf32, #tpu.memory_space<vmem>>, %arg5: memref<1024x128xf32, #tpu.memory_space<vmem>>) attributes {dimension_semantics = [#tpu.dimension_semantics<parallel>], iteration_bounds = array<i64: 1>, scalar_prefetch = 0 : i64, scratch_operands = 0 : i64, tpu.core_type = #tpu.core_type<tc>, window_params = [{pipeline_mode = #tpu.pipeline_mode<synchronous>, transform_indices = @transform_0, window_bounds = array<i64: 1, 128>}, {pipeline_mode = #tpu.pipeline_mode<synchronous>, transform_indices = @transform_1, window_bounds = array<i64: 1024, 128>}, {pipeline_mode = #tpu.pipeline_mode<synchronous>, transform_indices = @transform_2, window_bounds = array<i64: 1024, 128>}, {transform_indices = @transform_3, window_bounds = array<i64: 1024, 128>}, {transform_indices = @transform_4, window_bounds = array<i64: 1024, 128>}]} {
    %c1024_i32 = arith.constant 1024 : i32
    %0 = arith.muli %arg0, %c1024_i32 : i32
    %1 = arith.sitofp %0 : i32 to f32
    %c0 = arith.constant 0 : index
    %c0_0 = arith.constant 0 : index
    %2 = vector.load %arg1[%c0, %c0_0] : memref<1x128xf32, #tpu.memory_space<vmem>>, vector<1x128xf32>
    %3 = vector.broadcast %1 : f32 to vector<1x128xf32>
    %4 = arith.mulf %3, %2 : vector<1x128xf32>
    %5 = math.cos %4 : vector<1x128xf32>
    %6 = math.sin %4 : vector<1x128xf32>
    %c0_1 = arith.constant 0 : index
    %c0_2 = arith.constant 0 : index
    %7 = vector.load %arg2[%c0_1, %c0_2] : memref<1024x128xf32, #tpu.memory_space<vmem>>, vector<1024x128xf32>
    %8 = vector.broadcast %5 : vector<1x128xf32> to vector<1024x128xf32>
    %9 = arith.mulf %8, %7 : vector<1024x128xf32>
    %c0_3 = arith.constant 0 : index
    %c0_4 = arith.constant 0 : index
    %10 = vector.load %arg3[%c0_3, %c0_4] : memref<1024x128xf32, #tpu.memory_space<vmem>>, vector<1024x128xf32>
    %11 = vector.broadcast %6 : vector<1x128xf32> to vector<1024x128xf32>
    %12 = arith.mulf %11, %10 : vector<1024x128xf32>
    %13 = arith.subf %9, %12 : vector<1024x128xf32>
    %c0_5 = arith.constant 0 : index
    %c0_6 = arith.constant 0 : index
    %14 = vector.load %arg2[%c0_5, %c0_6] : memref<1024x128xf32, #tpu.memory_space<vmem>>, vector<1024x128xf32>
    %15 = vector.broadcast %6 : vector<1x128xf32> to vector<1024x128xf32>
    %16 = arith.mulf %15, %14 : vector<1024x128xf32>
    %c0_7 = arith.constant 0 : index
    %c0_8 = arith.constant 0 : index
    %17 = vector.load %arg3[%c0_7, %c0_8] : memref<1024x128xf32, #tpu.memory_space<vmem>>, vector<1024x128xf32>
    %18 = vector.broadcast %5 : vector<1x128xf32> to vector<1024x128xf32>
    %19 = arith.mulf %18, %17 : vector<1024x128xf32>
    %20 = arith.addf %16, %19 : vector<1024x128xf32>
    %c0_9 = arith.constant 0 : index
    %c0_10 = arith.constant 0 : index
    %21 = vector.load %arg4[%c0_9, %c0_10] : memref<1024x128xf32, #tpu.memory_space<vmem>>, vector<1024x128xf32>
    tpu.vector_store %arg4[%c0_9, %c0_10], %13 {strides = array<i32>} : memref<1024x128xf32, #tpu.memory_space<vmem>>, vector<1024x128xf32>,
    %c0_11 = arith.constant 0 : index
    %c0_12 = arith.constant 0 : index
    %22 = vector.load %arg5[%c0_11, %c0_12] : memref<1024x128xf32, #tpu.memory_space<vmem>>, vector<1024x128xf32>
    tpu.vector_store %arg5[%c0_11, %c0_12], %20 {strides = array<i32>} : memref<1024x128xf32, #tpu.memory_space<vmem>>, vector<1024x128xf32>,
    return
  }
  func.func @transform_0(%arg0: i32) -> (i32, i32) {
    %c0_i32 = arith.constant 0 : i32
    %c0_i32_0 = arith.constant 0 : i32
    %c0_i32_1 = arith.constant 0 : i32
    return %c0_i32, %c0_i32_0 : i32, i32
  }
  func.func @transform_1(%arg0: i32) -> (i32, i32) {
    %c0_i32 = arith.constant 0 : i32
    %c0_i32_0 = arith.constant 0 : i32
    %c0_i32_1 = arith.constant 0 : i32
    return %c0_i32, %c0_i32_0 : i32, i32
  }
  func.func @transform_2(%arg0: i32) -> (i32, i32) {
    %c0_i32 = arith.constant 0 : i32
    %c0_i32_0 = arith.constant 0 : i32
    %c0_i32_1 = arith.constant 0 : i32
    return %c0_i32, %c0_i32_0 : i32, i32
  }
  func.func @transform_3(%arg0: i32) -> (i32, i32) {
    %c0_i32 = arith.constant 0 : i32
    %c0_i32_0 = arith.constant 0 : i32
    return %arg0, %c0_i32 : i32, i32
  }
  func.func @transform_4(%arg0: i32) -> (i32, i32) {
    %c0_i32 = arith.constant 0 : i32
    %c0_i32_0 = arith.constant 0 : i32
    return %arg0, %c0_i32 : i32, i32
  }
}

</mosaic_0001>

<bundles_post_ra>
// kernel: tpu_custom_call.1
= control target key start
LH: loop header
LB: loop body
LE: loop exit
PB: predicated region body
PF: predicated region fallthrough
CT: control target
= control target key end

     0   :  { %10 = vsyncpa [#allocation3], 0  ;;  %s2733_s0 = inlined_call_operand.hbm [shape: f32[1,128], index: 0, kind: input, shape index: {}]   ;;  %s2734_s1 = inlined_call_operand.hbm [shape: f32[1024,128], index: 1, kind: input, shape index: {}]   ;;  %s2735_s2 = inlined_call_operand.hbm [shape: f32[1024,128], index: 2, kind: input, shape index: {}]   ;;  %s2736_s3 = inlined_call_operand.hbm [shape: f32[1024,128], index: 3, kind: output, shape index: {0}]   ;;  %s2737_s4 = inlined_call_operand.hbm [shape: f32[1024,128], index: 4, kind: output, shape index: {1}]  }
   0x1   :  { %11 = vsyncpa [#allocation6], 0 }
   0x2   :  { %12 = vsyncpa [#allocation4], 0  ;;  %s29_s17 = sshll.u32 %s2734_s1, 4  ;;  %s30_s17 = int_to_ptr.hbm [resolvable:$true] %s29_s17 }
   0x3   :  { %13 = vsyncpa [#allocation10], 0  ;;  %s2105_s18 = smov [#allocation5]   ;;  %s19_s22 = sshll.u32 %s2733_s0, 4  ;;  %s20_s22 = int_to_ptr.hbm [resolvable:$true] %s19_s22 }
   0x4   :  { %s31_s19 = sshll.u32 %s2105_s18, 4  ;;  %s2106_s23 = smov 128   ;;  %s32_s19 = int_to_ptr.vmem [resolvable:$true] %s31_s19 }
   0x5   :  { %s2107_s24 = smov 8   ;;  %s2108_s25 = smov [#allocation2]  }
   0x6   :  { %37 = dma.hbm_to_vmem [thread:$0]  %s30_s17, 16384, %s32_s19, [#allocation6], %s2106_s23, %s2106_s23, %s2107_s24  }
   0x7   :  { %s21_s26 = sshll.u32 %s2108_s25, 4  ;;  %s42_s28 = sshll.u32 %s2735_s2, 4  ;;  %s22_s26 = int_to_ptr.vmem [resolvable:$true] %s21_s26  ;;  %s43_s28 = int_to_ptr.hbm [resolvable:$true] %s42_s28 }
   0x8   :  { %24 = dma.hbm_to_vmem [thread:$0]  %s20_s22, 16, %s22_s26, [#allocation3]  }
   0x9   :  { %s2109_s29 = smov [#allocation7]  }
   0xa   :  { %s44_s30 = sshll.u32 %s2109_s29, 4  ;;  %s45_s30 = int_to_ptr.vmem [resolvable:$true] %s44_s30 }
   0xb   :  { %50 = dma.hbm_to_vmem [thread:$0]  %s43_s28, 16384, %s45_s30, [#allocation6], %s2106_s23, %s2106_s23, %s2107_s24  }
   0xc   :  { %2097 = dma.done.wait [#allocation3], 16  }
   0xd   :  { %2098 = vsyncadd [#allocation3], 4294967280 }
   0xe   :  { %2099 = dma.done.wait [#allocation6], 32768  }
   0xf   :  { %2100 = vsyncadd [#allocation6], 4294934528  ;;  %v65_v0 = vld [vmem:[#allocation2] sm:$0x1]  ;;  %v2110_v13 = vmov 683565275  }
  0x10   :  { %v2159_v1 = vmul.f32 0.0, %v65_v0  ;;  %v2111_v15 = vmov 2475754826   ;;  %v2112_v17 = vmov 2131351028   ;;  %s2117_s0 = smov [#allocation8]  }
  0x11   :  { %v2113_v19 = vmov 2102212464   ;;  %v2114_v21 = vmov 920167782   ;;  %v2115_v27 = vmov 1326507024  }
  0x12   :  { %v71_v2 = vand.u32 2139095040, %v2159_v1  ;;  %v68_v4 = vand.u32 2147483647, %v2159_v1  ;;  %vm70_vm12 = vcmp.lt.s32.totalorder %v2159_v1, 0  ;;  %s1667_s2 = sshll.u32 %s2117_s0, 4  ;;  %s1669_s7 = sshll.u32 %s2736_s3, 4  ;;  %s1668_s2 = int_to_ptr.vmem [resolvable:$true] %s1667_s2  ;;  %s1670_s7 = int_to_ptr.hbm [resolvable:$true] %s1669_s7 }
  0x13   :  { %s2118_s3 = smov [#allocation9]   ;;  %s1682_s11 = sshll.u32 %s2737_s4, 4  ;;  %s1683_s11 = int_to_ptr.hbm [resolvable:$true] %s1682_s11 }
  0x14   :  { %v72_v3 = vshrl.u32 %v71_v2, 23  ;;  %v75_v7 = vand.u32 8388607, %v68_v4  ;;  %v2116_v2 = vmov 0   ;;  %vm69_vm13 = vcmp.le.f32.partialorder %v68_v4, 0.7853982 }
  0x15   :  { %s1680_s8 = sshll.u32 %s2118_s3, 4  ;;  %s1681_s8 = int_to_ptr.vmem [resolvable:$true] %s1680_s8 }
  0x16   :  { %v1701_v5 = vadd.s32 4294967169, %v72_v3  ;;  %v76_v10 = vor.u32 8388608, %v75_v7 }
  0x18   :  { %v78_v6 = vadd.s32 1, %v1701_v5  ;;  %v2168_v29 = vshll.u32 %v76_v10, 8 }
  0x1a   :  { %vm79_vm0 = vcmp.gt.s32.totalorder %v78_v6, 0  ;;  %v117_v41 = vand.u32 65535, %v2168_v29  ;;  %v118_v42 = vshrl.u32 %v2168_v29, 16 }
  0x1b   :  { %v80_v8 = vsel %vm79_vm0, %v78_v6, 0 }
  0x1c   :  { %v82_v9 = vand.u32 31, %v80_v8  ;;  %v2165_v11 = vshrl.u32 %v80_v8, 5 }
  0x1e   :  { %v83_v12 = vsub.s32 32, %v82_v9  ;;  %v85_v14 = vshll.u32 %v2110_v13, %v82_v9  ;;  %v88_v16 = vshll.u32 %v2111_v15, %v82_v9  ;;  %v91_v18 = vshll.u32 %v2112_v17, %v82_v9 }
  0x1f   :  { %v94_v20 = vshll.u32 %v2113_v19, %v82_v9  ;;  %v97_v22 = vshll.u32 %v2114_v21, %v82_v9  ;;  %vm100_vm1 = vcmp.lt.s32.totalorder %v2165_v11, 1  ;;  %vm103_vm2 = vcmp.lt.s32.totalorder %v2165_v11, 4 }
  0x20   :  { %v86_v23 = vshrl.u32 %v2111_v15, %v83_v12  ;;  %v89_v24 = vshrl.u32 %v2112_v17, %v83_v12  ;;  %v92_v25 = vshrl.u32 %v2113_v19, %v83_v12  ;;  %v95_v26 = vshrl.u32 %v2114_v21, %v83_v12 }
  0x21   :  { %v98_v28 = vshrl.u32 %v2115_v27, %v83_v12  ;;  %vm102_vm3 = vcmp.lt.s32.totalorder %v2165_v11, 3  ;;  %vm101_vm4 = vcmp.lt.s32.totalorder %v2165_v11, 2  ;;  %v84_v49 = vshrl.u32 %v2110_v13, %v83_v12 }
  0x22   :  { %v87_v30 = vor.u32 %v86_v23, %v85_v14  ;;  %v90_v31 = vor.u32 %v89_v24, %v88_v16  ;;  %v93_v32 = vor.u32 %v92_v25, %v91_v18  ;;  %v96_v33 = vor.u32 %v95_v26, %v94_v20 }
  0x23   :  { %v99_v34 = vor.u32 %v98_v28, %v97_v22 }
  0x24   :  { %v108_v35 = vsel %vm100_vm1, %v87_v30, %v90_v31  ;;  %v112_v36 = vsel %vm100_vm1, %v90_v31, %v93_v32  ;;  %v109_v37 = vsel %vm103_vm2, %v96_v33, 920167782  ;;  %v104_v62 = vsel %vm100_vm1, %v84_v49, %v87_v30 }
  0x25   :  { %v113_v38 = vsel %vm103_vm2, %v99_v34, 1326507024  ;;  %v110_v39 = vsel %vm102_vm3, %v93_v32, %v109_v37  ;;  %v105_v0 = vsel %vm103_vm2, %v93_v32, 2102212464 }
  0x26   :  { %v114_v40 = vsel %vm102_vm3, %v96_v33, %v113_v38  ;;  %v111_v43 = vsel %vm101_vm4, %v108_v35, %v110_v39  ;;  %v106_v13 = vsel %vm102_vm3, %v90_v31, %v105_v0 }
  0x27   :  { %v115_v44 = vsel %vm101_vm4, %v112_v36, %v114_v40  ;;  %v141_v47 = vand.u32 65535, %v111_v43  ;;  %v142_v48 = vshrl.u32 %v111_v43, 16  ;;  %v107_v21 = vsel %vm101_vm4, %v104_v62, %v106_v13 }
  0x28   :  { %v119_v45 = vand.u32 65535, %v115_v44  ;;  %v120_v46 = vshrl.u32 %v115_v44, 16  ;;  %v161_v25 = vmul.u32 %v2168_v29, %v107_v21  ;;  %vm211_vm4 = vweird.f32 %v2159_v1 }
  0x29   :  { %v143_v53 = vmul.u32 %v141_v47, %v117_v41  ;;  %v144_v54 = vmul.u32 %v142_v48, %v117_v41  ;;  %v145_v55 = vmul.u32 %v141_v47, %v118_v42  ;;  %v146_v59 = vmul.u32 %v142_v48, %v118_v42 }
  0x2a   :  { %v121_v50 = vmul.u32 %v119_v45, %v117_v41  ;;  %v122_v51 = vmul.u32 %v120_v46, %v117_v41  ;;  %v123_v52 = vmul.u32 %v119_v45, %v118_v42  ;;  %v124_v56 = vmul.u32 %v120_v46, %v118_v42 }
  0x2b   :  { %v147_v60 = vshll.u32 %v144_v54, 16  ;;  %v149_v61 = vshll.u32 %v145_v55, 16  ;;  %v148_v10 = vshrl.u32 %v144_v54, 16  ;;  %v150_v17 = vshrl.u32 %v145_v55, 16 }
  0x2c   :  { %v125_v57 = vshll.u32 %v122_v51, 16  ;;  %v127_v58 = vshll.u32 %v123_v52, 16  ;;  %v126_v6 = vshrl.u32 %v122_v51, 16  ;;  %v128_v14 = vshrl.u32 %v123_v52, 16 }
  0x2d   :  { %vm151_vm6 = vc.u32 %v143_v53, %v147_v60  ;;  %v153_v5 = vadd.s32 %v147_v60, %v143_v53 }
  0x2e   :  { %vm129_vm5 = vc.u32 %v121_v50, %v125_v57  ;;  %v131_v63 = vadd.s32 %v125_v57, %v121_v50  ;;  %v152_v8 = vsel %vm151_vm6, 1, %v2116_v2 }
  0x2f   :  { %v130_v3 = vsel %vm129_vm5, 1, %v2116_v2  ;;  %v154_v12 = vadd.s32 %v152_v8, %v146_v59  ;;  %vm155_vm8 = vc.u32 %v153_v5, %v149_v61  ;;  %v157_v20 = vadd.s32 %v153_v5, %v149_v61 }
  0x30   :  { %v132_v7 = vadd.s32 %v130_v3, %v124_v56  ;;  %vm133_vm7 = vc.u32 %v131_v63, %v127_v58  ;;  %v156_v16 = vsel %vm155_vm8, 1, %v2116_v2 }
  0x31   :  { %v134_v9 = vsel %vm133_vm7, 1, %v2116_v2  ;;  %v158_v18 = vadd.s32 %v156_v16, %v154_v12 }
  0x32   :  { %v136_v15 = vadd.s32 %v134_v9, %v132_v7 }
  0x33   :  { %v159_v22 = vadd.s32 %v158_v18, %v148_v10  ;;  %v377_v18 = vld [vmem:[#allocation5] sm:$0xff] }
  0x34   :  { %v137_v19 = vadd.s32 %v136_v15, %v126_v6 }
  0x35   :  { %v160_v24 = vadd.s32 %v159_v22, %v150_v17  ;;  %v378_v22 = vld [vmem:[#allocation5 + $0x8] sm:$0xff] }
  0x36   :  { %v138_v23 = vadd.s32 %v137_v19, %v128_v14  ;;  %v636_v19 = vld [vmem:[#allocation7] sm:$0xff] }
  0x37   :  { %v164_v26 = vadd.s32 1, %v160_v24 }
  0x38   :  { %vm163_vm9 = vc.u32 %v138_v23, %v157_v20  ;;  %v162_v11 = vadd.s32 %v157_v20, %v138_v23  ;;  %v637_v23 = vld [vmem:[#allocation7 + $0x8] sm:$0xff] }
  0x39   :  { %v165_v27 = vsel %vm163_vm9, %v164_v26, %v160_v24  ;;  %v379_v24 = vld [vmem:[#allocation5 + $0x10] sm:$0xff] }
  0x3a   :  { %v166_v28 = vadd.s32 %v165_v27, %v161_v25  ;;  %v638_v27 = vld [vmem:[#allocation7 + $0x10] sm:$0xff] }
  0x3c   :  { %v167_v30 = vadd.s32 536870912, %v166_v28 }
  0x3e   :  { %v168_v31 = vshrl.u32 %v167_v30, 30  ;;  %v639_v30 = vld [vmem:[#allocation7 + $0x18] sm:$0xff] }
  0x40   :  { %v169_v32 = vshll.u32 %v168_v31, 30  ;;  %v192_v49 = vsub.s32 4, %v168_v31 }
  0x42   :  { %v170_v33 = vsub.s32 %v166_v28, %v169_v32  ;;  %v193_v52 = vsel %vm70_vm12, %v192_v49, %v168_v31  ;;  %v380_v28 = vld [vmem:[#allocation5 + $0x18] sm:$0xff]  ;;  %v381_v31 = vld [vmem:[#allocation5 + $0x20] sm:$0xff] }
  0x43   :  { %v195_v55 = vsel %vm69_vm13, 0, %v193_v52  ;;  %v644_v49 = vld [vmem:[#allocation7 + $0x40] sm:$0xff] }
  0x44   :  { %vm171_vm10 = vcmp.lt.s32.totalorder %v170_v33, 0  ;;  %v172_v34 = vsub.s32 0, %v170_v33  ;;  %v366_v60 = vadd.s32 3, %v195_v55  ;;  %v212_v2 = vand.u32 3, %v195_v55  ;;  %v645_v55 = vld [vmem:[#allocation7 + $0x48] sm:$0xff] }
  0x46   :  { %v173_v35 = vsel %vm171_vm10, %v172_v34, %v170_v33  ;;  %v367_v3 = vand.u32 3, %v366_v60  ;;  %vm217_vm14 = vcmp.eq.s32.totalorder %v212_v2, 2  ;;  %vm213_vm0 = vcmp.lt.s32.totalorder %v212_v2, 2 }
  0x47   :  { %v174_v36 = vclz %v173_v35  ;;  %vm214_vm1 = vcmp.eq.s32.totalorder %v212_v2, 0 }
  0x48   :  { %vm372_vm15 = vcmp.eq.s32.totalorder %v367_v3, 2  ;;  %vm369_vm2 = vcmp.eq.s32.totalorder %v367_v3, 0  ;;  %vm368_vm3 = vcmp.lt.s32.totalorder %v367_v3, 2 }
  0x49   :  { %v1702_v37 = vadd.s32 4294967294, %v174_v36  ;;  %v382_v36 = vld [vmem:[#allocation5 + $0x28] sm:$0xff] }
  0x4b   :  { %vm1703_vm11 = vcmp.lt.s32.totalorder %v1702_v37, 0 }
  0x4c   :  { %v177_v38 = vsel %vm1703_vm11, 0, %v1702_v37  ;;  %v641_v37 = vld [vmem:[#allocation7 + $0x28] sm:$0xff] }
  0x4d   :  { %v178_v39 = vsub.s32 32, %v177_v38  ;;  %v179_v40 = vshll.u32 %v170_v33, %v177_v38  ;;  %v182_v41 = vsub.s32 4294967266, %v177_v38 }
  0x4f   :  { %v180_v29 = vshrl.u32 %v162_v11, %v178_v39  ;;  %v183_v42 = vadd.s32 127, %v182_v41  ;;  %v383_v41 = vld [vmem:[#allocation5 + $0x30] sm:$0xff] }
  0x51   :  { %v181_v43 = vor.u32 %v180_v29, %v179_v40  ;;  %v184_v44 = vshll.u32 %v183_v42, 23  ;;  %v642_v29 = vld [vmem:[#allocation7 + $0x30] sm:$0xff]  ;;  %v384_v42 = vld [vmem:[#allocation5 + $0x38] sm:$0xff] }
  0x53   :  { %v185_v45 = vor.u32 4788187, %v184_v44  ;;  %v188_v46 = vcvt.s32.f32 %v181_v43 }
  0x55   :  { %v186_v47 = vand.u32 2147483647, %v185_v45 }
  0x57   :  { %v189_v48 = vmul.f32 %v188_v46, %v186_v47  ;;  %v643_v47 = vld [vmem:[#allocation7 + $0x38] sm:$0xff] }
  0x59   :  { %v190_v50 = vxor.u32 2147483648, %v189_v48 }
  0x5b   :  { %v191_v51 = vsel %vm70_vm12, %v190_v50, %v189_v48  ;;  %v385_v48 = vld [vmem:[#allocation5 + $0x40] sm:$0xff] }
  0x5c   :  { %v194_v53 = vsel %vm69_vm13, %v2159_v1, %v191_v51  ;;  %v640_v1 = vld [vmem:[#allocation7 + $0x20] sm:$0xff] }
  0x5d   :  { %v196_v54 = vmul.f32 %v194_v53, %v194_v53 }
  0x5f   :  { %v197_v56 = vmul.f32 -0.001358992, %v196_v54  ;;  %v204_v57 = vmul.f32 -0.00019511016, %v196_v54 }
  0x61   :  { %v198_v58 = vadd.f32 0.041655596, %v197_v56  ;;  %v205_v59 = vadd.f32 0.008332121, %v204_v57  ;;  %v387_v56 = vld [vmem:[#allocation5 + $0x50] sm:$0xff] }
  0x63   :  { %v199_v61 = vmul.f32 %v198_v58, %v196_v54  ;;  %v206_v62 = vmul.f32 %v205_v59, %v196_v54 }
  0x65   :  { %v200_v63 = vadd.f32 -0.4999988, %v199_v61  ;;  %v207_v0 = vadd.f32 -0.16666654, %v206_v62  ;;  %v646_v61 = vld [vmem:[#allocation7 + $0x50] sm:$0xff]  ;;  %v388_v62 = vld [vmem:[#allocation5 + $0x58] sm:$0xff] }
  0x67   :  { %v201_v5 = vmul.f32 %v200_v63, %v196_v54  ;;  %v208_v4 = vmul.f32 %v207_v0, %v196_v54  ;;  %v386_v54 = vld [vmem:[#allocation5 + $0x48] sm:$0xff] }
  0x69   :  { %v202_v6 = vadd.f32 1.0, %v201_v5  ;;  %v209_v7 = vadd.f32 1.0, %v208_v4  ;;  %v647_v5 = vld [vmem:[#allocation7 + $0x58] sm:$0xff]  ;;  %v389_v4 = vld [vmem:[#allocation5 + $0x60] sm:$0xff] }
  0x6b   :  { %v210_v8 = vmul.f32 %v209_v7, %v194_v53  ;;  %v218_v9 = vxor.u32 2147483648, %v202_v6 }
  0x6d   :  { %v215_v10 = vxor.u32 2147483648, %v210_v8  ;;  %v219_v12 = vsel %vm217_vm14, %v218_v9, %v210_v8  ;;  %v374_v13 = vsel %vm372_vm15, %v218_v9, %v210_v8 }
  0x6f   :  { %v216_v14 = vsel %vm214_vm1, %v202_v6, %v215_v10  ;;  %v371_v15 = vsel %vm369_vm2, %v202_v6, %v215_v10  ;;  %v648_v6 = vld [vmem:[#allocation7 + $0x60] sm:$0xff] }
  0x70   :  { %v220_v16 = vsel %vm213_vm0, %v216_v14, %v219_v12  ;;  %v375_v17 = vsel %vm368_vm3, %v371_v15, %v374_v13  ;;  %v390_v12 = vld [vmem:[#allocation5 + $0x68] sm:$0xff] }
  0x71   :  { %v221_v20 = vsel %vm211_vm4, nan, %v220_v16  ;;  %v376_v21 = vsel %vm211_vm4, nan, %v375_v17  ;;  %v649_v13 = vld [vmem:[#allocation7 + $0x68] sm:$0xff]  ;;  %v391_v17 = vld [vmem:[#allocation5 + $0x70] sm:$0xff] }
  0x72   :  { %v2205_v25 = vperm.slane %v221_v20, 0  ;;  %v2207_v26 = vperm.slane %v376_v21, 0 }
  0x74   :  { %v508_v32 = vmul.f32 %v2205_v25, %v377_v18  ;;  %v767_v33 = vmul.f32 %v2207_v26, %v636_v19  ;;  %v509_v34 = vmul.f32 %v2205_v25, %v378_v22  ;;  %v768_v35 = vmul.f32 %v2207_v26, %v637_v23  ;;  %v650_v18 = vld [vmem:[#allocation7 + $0x70] sm:$0xff]  ;;  %v392_v23 = vld [vmem:[#allocation5 + $0x78] sm:$0xff] }
  0x75   :  { %v510_v11 = vmul.f32 %v2205_v25, %v379_v24  ;;  %v769_v38 = vmul.f32 %v2207_v26, %v638_v27  ;;  %v511_v39 = vmul.f32 %v2205_v25, %v380_v28  ;;  %v770_v40 = vmul.f32 %v2207_v26, %v639_v30  ;;  %v651_v24 = vld [vmem:[#allocation7 + $0x78] sm:$0xff] }
  0x76   :  { %v895_v43 = vsub.f32 %v508_v32, %v767_v33  ;;  %v896_v44 = vsub.f32 %v509_v34, %v768_v35  ;;  %v512_v45 = vmul.f32 %v2205_v25, %v381_v31  ;;  %v771_v46 = vmul.f32 %v2207_v26, %v640_v1  ;;  %v393_v31 = vld [vmem:[#allocation5 + $0x80] sm:$0xff]  ;;  %v394_v35 = vld [vmem:[#allocation5 + $0x88] sm:$0xff] }
  0x77   :  { %v897_v50 = vsub.f32 %v510_v11, %v769_v38  ;;  %v898_v51 = vsub.f32 %v511_v39, %v770_v40  ;;  %v513_v52 = vmul.f32 %v2205_v25, %v382_v36  ;;  %v772_v53 = vmul.f32 %v2207_v26, %v641_v37  ;;  %v652_v1 = vld [vmem:[#allocation7 + $0x80] sm:$0xff]  ;;  %v653_v36 = vld [vmem:[#allocation7 + $0x88] sm:$0xff]  ;;  %v395_v39 = vld [vmem:[#allocation5 + $0x90] sm:$0xff] }
  0x78   :  { %1407 = vst [vmem:[#allocation8] sm:$0xff] %v895_v43  ;;  %v899_v57 = vsub.f32 %v512_v45, %v771_v46  ;;  %v514_v58 = vmul.f32 %v2205_v25, %v383_v41  ;;  %v773_v59 = vmul.f32 %v2207_v26, %v642_v29  ;;  %v515_v60 = vmul.f32 %v2205_v25, %v384_v42  ;;  %v654_v40 = vld [vmem:[#allocation7 + $0x90] sm:$0xff]  ;;  %v396_v43 = vld [vmem:[#allocation5 + $0x98] sm:$0xff] }
  0x79   :  { %1408 = vst [vmem:[#allocation8 + $0x8] sm:$0xff] %v896_v44  ;;  %v900_v63 = vsub.f32 %v513_v52, %v772_v53  ;;  %v774_v0 = vmul.f32 %v2207_v26, %v643_v47  ;;  %v516_v2 = vmul.f32 %v2205_v25, %v385_v48  ;;  %v775_v3 = vmul.f32 %v2207_v26, %v644_v49  ;;  %v655_v44 = vld [vmem:[#allocation7 + $0x98] sm:$0xff]  ;;  %v397_v48 = vld [vmem:[#allocation5 + $0xa0] sm:$0xff]  ;;  %v398_v53 = vld [vmem:[#allocation5 + $0xa8] sm:$0xff] }
  0x7a   :  { %1409 = vst [vmem:[#allocation8 + $0x10] sm:$0xff] %v897_v50  ;;  %v901_v7 = vsub.f32 %v514_v58, %v773_v59  ;;  %v517_v8 = vmul.f32 %v2205_v25, %v386_v54  ;;  %v776_v9 = vmul.f32 %v2207_v26, %v645_v55  ;;  %v518_v10 = vmul.f32 %v2205_v25, %v387_v56  ;;  %v656_v49 = vld [vmem:[#allocation7 + $0xa0] sm:$0xff]  ;;  %v657_v54 = vld [vmem:[#allocation7 + $0xa8] sm:$0xff]  ;;  %v399_v58 = vld [vmem:[#allocation5 + $0xb0] sm:$0xff] }
  0x7b   :  { %1410 = vst [vmem:[#allocation8 + $0x18] sm:$0xff] %v898_v51  ;;  %v902_v14 = vsub.f32 %v515_v60, %v774_v0  ;;  %v777_v15 = vmul.f32 %v2207_v26, %v646_v61  ;;  %v519_v16 = vmul.f32 %v2205_v25, %v388_v62  ;;  %v903_v19 = vsub.f32 %v516_v2, %v775_v3  ;;  %v658_v59 = vld [vmem:[#allocation7 + $0xb0] sm:$0xff]  ;;  %v659_v0 = vld [vmem:[#allocation7 + $0xb8] sm:$0xff] }
  0x7c   :  { %1411 = vst [vmem:[#allocation8 + $0x20] sm:$0xff] %v899_v57  ;;  %v778_v20 = vmul.f32 %v2207_v26, %v647_v5  ;;  %v520_v21 = vmul.f32 %v2205_v25, %v389_v4  ;;  %v779_v22 = vmul.f32 %v2207_v26, %v648_v6  ;;  %v904_v27 = vsub.f32 %v517_v8, %v776_v9  ;;  %v401_v4 = vld [vmem:[#allocation5 + $0xc0] sm:$0xff] }
  0x7d   :  { %1412 = vst [vmem:[#allocation8 + $0x28] sm:$0xff] %v900_v63  ;;  %v521_v28 = vmul.f32 %v2205_v25, %v390_v12  ;;  %v780_v30 = vmul.f32 %v2207_v26, %v649_v13  ;;  %v905_v32 = vsub.f32 %v518_v10, %v777_v15  ;;  %v522_v33 = vmul.f32 %v2205_v25, %v391_v17  ;;  %v400_v63 = vld [vmem:[#allocation5 + $0xb8] sm:$0xff]  ;;  %v660_v6 = vld [vmem:[#allocation7 + $0xc0] sm:$0xff]  ;;  %v402_v10 = vld [vmem:[#allocation5 + $0xc8] sm:$0xff] }
  0x7e   :  { %1413 = vst [vmem:[#allocation8 + $0x30] sm:$0xff] %v901_v7  ;;  %v781_v34 = vmul.f32 %v2207_v26, %v650_v18  ;;  %v906_v37 = vsub.f32 %v519_v16, %v778_v20  ;;  %v523_v11 = vmul.f32 %v2205_v25, %v392_v23  ;;  %v782_v38 = vmul.f32 %v2207_v26, %v651_v24  ;;  %v661_v12 = vld [vmem:[#allocation7 + $0xc8] sm:$0xff]  ;;  %v403_v16 = vld [vmem:[#allocation5 + $0xd0] sm:$0xff] }
  0x7f   :  { %1414 = vst [vmem:[#allocation8 + $0x38] sm:$0xff] %v902_v14  ;;  %v907_v41 = vsub.f32 %v520_v21, %v779_v22  ;;  %v524_v29 = vmul.f32 %v2205_v25, %v393_v31  ;;  %v783_v42 = vmul.f32 %v2207_v26, %v652_v1  ;;  %v908_v45 = vsub.f32 %v521_v28, %v780_v30  ;;  %v662_v17 = vld [vmem:[#allocation7 + $0xd0] sm:$0xff]  ;;  %v404_v21 = vld [vmem:[#allocation5 + $0xd8] sm:$0xff]  ;;  %v405_v28 = vld [vmem:[#allocation5 + $0xe0] sm:$0xff] }
  0x80   :  { %1415 = vst [vmem:[#allocation8 + $0x40] sm:$0xff] %v903_v19  ;;  %v525_v46 = vmul.f32 %v2205_v25, %v394_v35  ;;  %v784_v47 = vmul.f32 %v2207_v26, %v653_v36  ;;  %v909_v50 = vsub.f32 %v522_v33, %v781_v34  ;;  %v526_v51 = vmul.f32 %v2205_v25, %v395_v39  ;;  %v663_v22 = vld [vmem:[#allocation7 + $0xd8] sm:$0xff]  ;;  %v664_v30 = vld [vmem:[#allocation7 + $0xe0] sm:$0xff]  ;;  %v406_v33 = vld [vmem:[#allocation5 + $0xe8] sm:$0xff] }
  0x81   :  { %1416 = vst [vmem:[#allocation8 + $0x48] sm:$0xff] %v904_v27  ;;  %v785_v52 = vmul.f32 %v2207_v26, %v654_v40  ;;  %v910_v55 = vsub.f32 %v523_v11, %v782_v38  ;;  %v527_v56 = vmul.f32 %v2205_v25, %v396_v43  ;;  %v786_v57 = vmul.f32 %v2207_v26, %v655_v44  ;;  %v665_v34 = vld [vmem:[#allocation7 + $0xe8] sm:$0xff]  ;;  %v407_v11 = vld [vmem:[#allocation5 + $0xf0] sm:$0xff] }
  0x82   :  { %1417 = vst [vmem:[#allocation8 + $0x50] sm:$0xff] %v905_v32  ;;  %v911_v60 = vsub.f32 %v524_v29, %v783_v42  ;;  %v528_v61 = vmul.f32 %v2205_v25, %v397_v48  ;;  %v787_v62 = vmul.f32 %v2207_v26, %v656_v49  ;;  %v912_v2 = vsub.f32 %v525_v46, %v784_v47  ;;  %v666_v38 = vld [vmem:[#allocation7 + $0xf0] sm:$0xff]  ;;  %v408_v29 = vld [vmem:[#allocation5 + $0xf8] sm:$0xff]  ;;  %v409_v46 = vld [vmem:[#allocation5 + $0x100] sm:$0xff] }
  0x83   :  { %1418 = vst [vmem:[#allocation8 + $0x58] sm:$0xff] %v906_v37  ;;  %v529_v3 = vmul.f32 %v2205_v25, %v398_v53  ;;  %v788_v5 = vmul.f32 %v2207_v26, %v657_v54  ;;  %v913_v7 = vsub.f32 %v526_v51, %v785_v52  ;;  %v530_v8 = vmul.f32 %v2205_v25, %v399_v58  ;;  %v667_v42 = vld [vmem:[#allocation7 + $0xf8] sm:$0xff]  ;;  %v668_v47 = vld [vmem:[#allocation7 + $0x100] sm:$0xff]  ;;  %v410_v51 = vld [vmem:[#allocation5 + $0x108] sm:$0xff] }
  0x84   :  { %1419 = vst [vmem:[#allocation8 + $0x60] sm:$0xff] %v907_v41  ;;  %v789_v9 = vmul.f32 %v2207_v26, %v658_v59  ;;  %v914_v13 = vsub.f32 %v527_v56, %v786_v57  ;;  %v531_v14 = vmul.f32 %v2205_v25, %v400_v63  ;;  %v790_v15 = vmul.f32 %v2207_v26, %v659_v0  ;;  %v669_v52 = vld [vmem:[#allocation7 + $0x108] sm:$0xff]  ;;  %v411_v56 = vld [vmem:[#allocation5 + $0x110] sm:$0xff] }
  0x85   :  { %1420 = vst [vmem:[#allocation8 + $0x68] sm:$0xff] %v908_v45  ;;  %v915_v18 = vsub.f32 %v528_v61, %v787_v62  ;;  %v532_v19 = vmul.f32 %v2205_v25, %v401_v4  ;;  %v791_v20 = vmul.f32 %v2207_v26, %v660_v6  ;;  %v916_v23 = vsub.f32 %v529_v3, %v788_v5  ;;  %v670_v57 = vld [vmem:[#allocation7 + $0x110] sm:$0xff]  ;;  %v412_v61 = vld [vmem:[#allocation5 + $0x118] sm:$0xff]  ;;  %v413_v3 = vld [vmem:[#allocation5 + $0x120] sm:$0xff] }
  0x86   :  { %1421 = vst [vmem:[#allocation8 + $0x70] sm:$0xff] %v909_v50  ;;  %v533_v24 = vmul.f32 %v2205_v25, %v402_v10  ;;  %v792_v27 = vmul.f32 %v2207_v26, %v661_v12  ;;  %v917_v31 = vsub.f32 %v530_v8, %v789_v9  ;;  %v534_v1 = vmul.f32 %v2205_v25, %v403_v16  ;;  %v671_v62 = vld [vmem:[#allocation7 + $0x118] sm:$0xff]  ;;  %v672_v5 = vld [vmem:[#allocation7 + $0x120] sm:$0xff]  ;;  %v414_v8 = vld [vmem:[#allocation5 + $0x128] sm:$0xff] }
  0x87   :  { %1422 = vst [vmem:[#allocation8 + $0x78] sm:$0xff] %v910_v55  ;;  %v793_v32 = vmul.f32 %v2207_v26, %v662_v17  ;;  %v918_v35 = vsub.f32 %v531_v14, %v790_v15  ;;  %v535_v36 = vmul.f32 %v2205_v25, %v404_v21  ;;  %v794_v37 = vmul.f32 %v2207_v26, %v663_v22  ;;  %v673_v9 = vld [vmem:[#allocation7 + $0x128] sm:$0xff]  ;;  %v415_v14 = vld [vmem:[#allocation5 + $0x130] sm:$0xff] }
  0x88   :  { %1423 = vst [vmem:[#allocation8 + $0x80] sm:$0xff] %v911_v60  ;;  %v919_v39 = vsub.f32 %v532_v19, %v791_v20  ;;  %v536_v40 = vmul.f32 %v2205_v25, %v405_v28  ;;  %v795_v41 = vmul.f32 %v2207_v26, %v664_v30  ;;  %v920_v43 = vsub.f32 %v533_v24, %v792_v27  ;;  %v674_v15 = vld [vmem:[#allocation7 + $0x130] sm:$0xff]  ;;  %v416_v19 = vld [vmem:[#allocation5 + $0x138] sm:$0xff]  ;;  %v417_v24 = vld [vmem:[#allocation5 + $0x140] sm:$0xff] }
  0x89   :  { %1424 = vst [vmem:[#allocation8 + $0x88] sm:$0xff] %v912_v2  ;;  %v537_v44 = vmul.f32 %v2205_v25, %v406_v33  ;;  %v796_v45 = vmul.f32 %v2207_v26, %v665_v34  ;;  %v921_v48 = vsub.f32 %v534_v1, %v793_v32  ;;  %v538_v49 = vmul.f32 %v2205_v25, %v407_v11  ;;  %v675_v20 = vld [vmem:[#allocation7 + $0x138] sm:$0xff]  ;;  %v676_v27 = vld [vmem:[#allocation7 + $0x140] sm:$0xff]  ;;  %v418_v1 = vld [vmem:[#allocation5 + $0x148] sm:$0xff] }
  0x8a   :  { %1425 = vst [vmem:[#allocation8 + $0x90] sm:$0xff] %v913_v7  ;;  %v797_v50 = vmul.f32 %v2207_v26, %v666_v38  ;;  %v922_v53 = vsub.f32 %v535_v36, %v794_v37  ;;  %v539_v54 = vmul.f32 %v2205_v25, %v408_v29  ;;  %v798_v55 = vmul.f32 %v2207_v26, %v667_v42  ;;  %v677_v32 = vld [vmem:[#allocation7 + $0x148] sm:$0xff]  ;;  %v419_v36 = vld [vmem:[#allocation5 + $0x150] sm:$0xff] }
  0x8b   :  { %1426 = vst [vmem:[#allocation8 + $0x98] sm:$0xff] %v914_v13  ;;  %v923_v58 = vsub.f32 %v536_v40, %v795_v41  ;;  %v540_v59 = vmul.f32 %v2205_v25, %v409_v46  ;;  %v799_v60 = vmul.f32 %v2207_v26, %v668_v47  ;;  %v924_v63 = vsub.f32 %v537_v44, %v796_v45  ;;  %v678_v37 = vld [vmem:[#allocation7 + $0x150] sm:$0xff]  ;;  %v420_v40 = vld [vmem:[#allocation5 + $0x158] sm:$0xff]  ;;  %v421_v44 = vld [vmem:[#allocation5 + $0x160] sm:$0xff] }
  0x8c   :  { %1427 = vst [vmem:[#allocation8 + $0xa0] sm:$0xff] %v915_v18  ;;  %v541_v0 = vmul.f32 %v2205_v25, %v410_v51  ;;  %v800_v2 = vmul.f32 %v2207_v26, %v669_v52  ;;  %v925_v4 = vsub.f32 %v538_v49, %v797_v50  ;;  %v542_v6 = vmul.f32 %v2205_v25, %v411_v56  ;;  %v679_v41 = vld [vmem:[#allocation7 + $0x158] sm:$0xff]  ;;  %v680_v45 = vld [vmem:[#allocation7 + $0x160] sm:$0xff]  ;;  %v422_v49 = vld [vmem:[#allocation5 + $0x168] sm:$0xff] }
  0x8d   :  { %1428 = vst [vmem:[#allocation8 + $0xa8] sm:$0xff] %v916_v23  ;;  %v801_v7 = vmul.f32 %v2207_v26, %v670_v57  ;;  %v926_v10 = vsub.f32 %v539_v54, %v798_v55  ;;  %v543_v12 = vmul.f32 %v2205_v25, %v412_v61  ;;  %v802_v13 = vmul.f32 %v2207_v26, %v671_v62  ;;  %v681_v50 = vld [vmem:[#allocation7 + $0x168] sm:$0xff]  ;;  %v423_v54 = vld [vmem:[#allocation5 + $0x170] sm:$0xff] }
  0x8e   :  { %1429 = vst [vmem:[#allocation8 + $0xb0] sm:$0xff] %v917_v31  ;;  %v927_v16 = vsub.f32 %v540_v59, %v799_v60  ;;  %v544_v17 = vmul.f32 %v2205_v25, %v413_v3  ;;  %v803_v18 = vmul.f32 %v2207_v26, %v672_v5  ;;  %v928_v21 = vsub.f32 %v541_v0, %v800_v2  ;;  %v682_v55 = vld [vmem:[#allocation7 + $0x170] sm:$0xff]  ;;  %v424_v59 = vld [vmem:[#allocation5 + $0x178] sm:$0xff]  ;;  %v425_v0 = vld [vmem:[#allocation5 + $0x180] sm:$0xff] }
  0x8f   :  { %1430 = vst [vmem:[#allocation8 + $0xb8] sm:$0xff] %v918_v35  ;;  %v545_v22 = vmul.f32 %v2205_v25, %v414_v8  ;;  %v804_v23 = vmul.f32 %v2207_v26, %v673_v9  ;;  %v929_v28 = vsub.f32 %v542_v6, %v801_v7  ;;  %v546_v30 = vmul.f32 %v2205_v25, %v415_v14  ;;  %v683_v60 = vld [vmem:[#allocation7 + $0x178] sm:$0xff]  ;;  %v684_v2 = vld [vmem:[#allocation7 + $0x180] sm:$0xff]  ;;  %v426_v6 = vld [vmem:[#allocation5 + $0x188] sm:$0xff] }
  0x90   :  { %1431 = vst [vmem:[#allocation8 + $0xc0] sm:$0xff] %v919_v39  ;;  %v805_v31 = vmul.f32 %v2207_v26, %v674_v15  ;;  %v930_v33 = vsub.f32 %v543_v12, %v802_v13  ;;  %v547_v34 = vmul.f32 %v2205_v25, %v416_v19  ;;  %v806_v35 = vmul.f32 %v2207_v26, %v675_v20  ;;  %v685_v7 = vld [vmem:[#allocation7 + $0x188] sm:$0xff]  ;;  %v427_v12 = vld [vmem:[#allocation5 + $0x190] sm:$0xff] }
  0x91   :  { %1432 = vst [vmem:[#allocation8 + $0xc8] sm:$0xff] %v920_v43  ;;  %v931_v11 = vsub.f32 %v544_v17, %v803_v18  ;;  %v548_v38 = vmul.f32 %v2205_v25, %v417_v24  ;;  %v807_v39 = vmul.f32 %v2207_v26, %v676_v27  ;;  %v932_v29 = vsub.f32 %v545_v22, %v804_v23  ;;  %v686_v13 = vld [vmem:[#allocation7 + $0x190] sm:$0xff]  ;;  %v428_v17 = vld [vmem:[#allocation5 + $0x198] sm:$0xff]  ;;  %v429_v22 = vld [vmem:[#allocation5 + $0x1a0] sm:$0xff] }
  0x92   :  { %1433 = vst [vmem:[#allocation8 + $0xd0] sm:$0xff] %v921_v48  ;;  %v549_v42 = vmul.f32 %v2205_v25, %v418_v1  ;;  %v808_v43 = vmul.f32 %v2207_v26, %v677_v32  ;;  %v933_v46 = vsub.f32 %v546_v30, %v805_v31  ;;  %v550_v47 = vmul.f32 %v2205_v25, %v419_v36  ;;  %v687_v18 = vld [vmem:[#allocation7 + $0x198] sm:$0xff]  ;;  %v688_v23 = vld [vmem:[#allocation7 + $0x1a0] sm:$0xff]  ;;  %v430_v30 = vld [vmem:[#allocation5 + $0x1a8] sm:$0xff] }
  0x93   :  { %1434 = vst [vmem:[#allocation8 + $0xd8] sm:$0xff] %v922_v53  ;;  %v809_v48 = vmul.f32 %v2207_v26, %v678_v37  ;;  %v934_v51 = vsub.f32 %v547_v34, %v806_v35  ;;  %v551_v52 = vmul.f32 %v2205_v25, %v420_v40  ;;  %v810_v53 = vmul.f32 %v2207_v26, %v679_v41  ;;  %v689_v31 = vld [vmem:[#allocation7 + $0x1a8] sm:$0xff]  ;;  %v431_v34 = vld [vmem:[#allocation5 + $0x1b0] sm:$0xff] }
  0x94   :  { %1435 = vst [vmem:[#allocation8 + $0xe0] sm:$0xff] %v923_v58  ;;  %v935_v56 = vsub.f32 %v548_v38, %v807_v39  ;;  %v552_v57 = vmul.f32 %v2205_v25, %v421_v44  ;;  %v811_v58 = vmul.f32 %v2207_v26, %v680_v45  ;;  %v936_v61 = vsub.f32 %v549_v42, %v808_v43  ;;  %v690_v35 = vld [vmem:[#allocation7 + $0x1b0] sm:$0xff]  ;;  %v432_v38 = vld [vmem:[#allocation5 + $0x1b8] sm:$0xff]  ;;  %v433_v42 = vld [vmem:[#allocation5 + $0x1c0] sm:$0xff] }
  0x95   :  { %1436 = vst [vmem:[#allocation8 + $0xe8] sm:$0xff] %v924_v63  ;;  %v553_v62 = vmul.f32 %v2205_v25, %v422_v49  ;;  %v812_v63 = vmul.f32 %v2207_v26, %v681_v50  ;;  %v937_v3 = vsub.f32 %v550_v47, %v809_v48  ;;  %v554_v5 = vmul.f32 %v2205_v25, %v423_v54  ;;  %v691_v39 = vld [vmem:[#allocation7 + $0x1b8] sm:$0xff]  ;;  %v692_v43 = vld [vmem:[#allocation7 + $0x1c0] sm:$0xff]  ;;  %v434_v47 = vld [vmem:[#allocation5 + $0x1c8] sm:$0xff] }
  0x96   :  { %1437 = vst [vmem:[#allocation8 + $0xf0] sm:$0xff] %v925_v4  ;;  %v813_v4 = vmul.f32 %v2207_v26, %v682_v55  ;;  %v938_v8 = vsub.f32 %v551_v52, %v810_v53  ;;  %v555_v9 = vmul.f32 %v2205_v25, %v424_v59  ;;  %v939_v14 = vsub.f32 %v552_v57, %v811_v58  ;;  %v693_v48 = vld [vmem:[#allocation7 + $0x1c8] sm:$0xff]  ;;  %v435_v52 = vld [vmem:[#allocation5 + $0x1d0] sm:$0xff]  ;;  %v436_v57 = vld [vmem:[#allocation5 + $0x1d8] sm:$0xff] }
  0x97   :  { %1438 = vst [vmem:[#allocation8 + $0xf8] sm:$0xff] %v926_v10  ;;  %v814_v10 = vmul.f32 %v2207_v26, %v683_v60  ;;  %v556_v15 = vmul.f32 %v2205_v25, %v425_v0  ;;  %v940_v19 = vsub.f32 %v553_v62, %v812_v63  ;;  %v557_v20 = vmul.f32 %v2205_v25, %v426_v6  ;;  %v694_v53 = vld [vmem:[#allocation7 + $0x1d0] sm:$0xff]  ;;  %v695_v58 = vld [vmem:[#allocation7 + $0x1d8] sm:$0xff]  ;;  %v437_v62 = vld [vmem:[#allocation5 + $0x1e0] sm:$0xff] }
  0x98   :  { %1439 = vst [vmem:[#allocation8 + $0x100] sm:$0xff] %v927_v16  ;;  %v815_v16 = vmul.f32 %v2207_v26, %v684_v2  ;;  %v941_v24 = vsub.f32 %v554_v5, %v813_v4  ;;  %v558_v27 = vmul.f32 %v2205_v25, %v427_v12  ;;  %v559_v32 = vmul.f32 %v2205_v25, %v428_v17  ;;  %v696_v63 = vld [vmem:[#allocation7 + $0x1e0] sm:$0xff]  ;;  %v438_v5 = vld [vmem:[#allocation5 + $0x1e8] sm:$0xff] }
  0x99   :  { %1440 = vst [vmem:[#allocation8 + $0x108] sm:$0xff] %v928_v21  ;;  %v816_v21 = vmul.f32 %v2207_v26, %v685_v7  ;;  %v942_v1 = vsub.f32 %v555_v9, %v814_v10  ;;  %v560_v37 = vmul.f32 %v2205_v25, %v429_v22  ;;  %v561_v41 = vmul.f32 %v2205_v25, %v430_v30  ;;  %v697_v4 = vld [vmem:[#allocation7 + $0x1e8] sm:$0xff]  ;;  %v439_v9 = vld [vmem:[#allocation5 + $0x1f0] sm:$0xff] }
  0x9a   :  { %1441 = vst [vmem:[#allocation8 + $0x110] sm:$0xff] %v929_v28  ;;  %v817_v28 = vmul.f32 %v2207_v26, %v686_v13  ;;  %v943_v36 = vsub.f32 %v556_v15, %v815_v16  ;;  %v562_v45 = vmul.f32 %v2205_v25, %v431_v34  ;;  %v563_v50 = vmul.f32 %v2205_v25, %v432_v38  ;;  %v698_v10 = vld [vmem:[#allocation7 + $0x1f0] sm:$0xff]  ;;  %v440_v15 = vld [vmem:[#allocation5 + $0x1f8] sm:$0xff] }
  0x9b   :  { %1442 = vst [vmem:[#allocation8 + $0x118] sm:$0xff] %v930_v33  ;;  %v818_v33 = vmul.f32 %v2207_v26, %v687_v18  ;;  %v944_v40 = vsub.f32 %v557_v20, %v816_v21  ;;  %v564_v55 = vmul.f32 %v2205_v25, %v433_v42  ;;  %v565_v60 = vmul.f32 %v2205_v25, %v434_v47  ;;  %v699_v16 = vld [vmem:[#allocation7 + $0x1f8] sm:$0xff]  ;;  %v441_v20 = vld [vmem:[#allocation5 + $0x200] sm:$0xff] }
  0x9c   :  { %1443 = vst [vmem:[#allocation8 + $0x120] sm:$0xff] %v931_v11  ;;  %v819_v11 = vmul.f32 %v2207_v26, %v688_v23  ;;  %v945_v44 = vsub.f32 %v558_v27, %v817_v28  ;;  %v566_v2 = vmul.f32 %v2205_v25, %v435_v52  ;;  %v567_v7 = vmul.f32 %v2205_v25, %v436_v57  ;;  %v700_v21 = vld [vmem:[#allocation7 + $0x200] sm:$0xff]  ;;  %v442_v27 = vld [vmem:[#allocation5 + $0x208] sm:$0xff] }
  0x9d   :  { %1444 = vst [vmem:[#allocation8 + $0x128] sm:$0xff] %v932_v29  ;;  %v820_v29 = vmul.f32 %v2207_v26, %v689_v31  ;;  %v946_v49 = vsub.f32 %v559_v32, %v818_v33  ;;  %v568_v13 = vmul.f32 %v2205_v25, %v437_v62  ;;  %v569_v18 = vmul.f32 %v2205_v25, %v438_v5  ;;  %v701_v28 = vld [vmem:[#allocation7 + $0x208] sm:$0xff]  ;;  %v443_v32 = vld [vmem:[#allocation5 + $0x210] sm:$0xff] }
  0x9e   :  { %1445 = vst [vmem:[#allocation8 + $0x130] sm:$0xff] %v933_v46  ;;  %v821_v46 = vmul.f32 %v2207_v26, %v690_v35  ;;  %v947_v54 = vsub.f32 %v560_v37, %v819_v11  ;;  %v570_v23 = vmul.f32 %v2205_v25, %v439_v9  ;;  %v571_v31 = vmul.f32 %v2205_v25, %v440_v15  ;;  %v702_v33 = vld [vmem:[#allocation7 + $0x210] sm:$0xff]  ;;  %v444_v37 = vld [vmem:[#allocation5 + $0x218] sm:$0xff] }
  0x9f   :  { %1446 = vst [vmem:[#allocation8 + $0x138] sm:$0xff] %v934_v51  ;;  %v822_v51 = vmul.f32 %v2207_v26, %v691_v39  ;;  %v948_v59 = vsub.f32 %v561_v41, %v820_v29  ;;  %v572_v35 = vmul.f32 %v2205_v25, %v441_v20  ;;  %v703_v11 = vld [vmem:[#allocation7 + $0x218] sm:$0xff]  ;;  %v573_v39 = vmul.f32 %v2205_v25, %v442_v27  ;;  %v445_v41 = vld [vmem:[#allocation5 + $0x220] sm:$0xff] }
  0xa0   :  { %1447 = vst [vmem:[#allocation8 + $0x140] sm:$0xff] %v935_v56  ;;  %v823_v56 = vmul.f32 %v2207_v26, %v692_v43  ;;  %v949_v0 = vsub.f32 %v562_v45, %v821_v46  ;;  %v704_v29 = vld [vmem:[#allocation7 + $0x220] sm:$0xff]  ;;  %v574_v43 = vmul.f32 %v2205_v25, %v443_v32  ;;  %v446_v45 = vld [vmem:[#allocation5 + $0x228] sm:$0xff] }
  0xa1   :  { %1448 = vst [vmem:[#allocation8 + $0x148] sm:$0xff] %v936_v61  ;;  %v824_v61 = vmul.f32 %v2207_v26, %v693_v48  ;;  %v950_v6 = vsub.f32 %v563_v50, %v822_v51  ;;  %v705_v46 = vld [vmem:[#allocation7 + $0x228] sm:$0xff]  ;;  %v575_v48 = vmul.f32 %v2205_v25, %v444_v37  ;;  %v447_v50 = vld [vmem:[#allocation5 + $0x230] sm:$0xff] }
  0xa2   :  { %1449 = vst [vmem:[#allocation8 + $0x150] sm:$0xff] %v937_v3  ;;  %v825_v3 = vmul.f32 %v2207_v26, %v694_v53  ;;  %v951_v12 = vsub.f32 %v564_v55, %v823_v56  ;;  %v706_v51 = vld [vmem:[#allocation7 + $0x230] sm:$0xff]  ;;  %v576_v53 = vmul.f32 %v2205_v25, %v445_v41  ;;  %v448_v55 = vld [vmem:[#allocation5 + $0x238] sm:$0xff] }
  0xa3   :  { %1450 = vst [vmem:[#allocation8 + $0x158] sm:$0xff] %v938_v8  ;;  %v826_v8 = vmul.f32 %v2207_v26, %v695_v58  ;;  %v952_v17 = vsub.f32 %v565_v60, %v824_v61  ;;  %v707_v56 = vld [vmem:[#allocation7 + $0x238] sm:$0xff]  ;;  %v577_v58 = vmul.f32 %v2205_v25, %v446_v45  ;;  %v449_v60 = vld [vmem:[#allocation5 + $0x240] sm:$0xff] }
  0xa4   :  { %1451 = vst [vmem:[#allocation8 + $0x160] sm:$0xff] %v939_v14  ;;  %v827_v14 = vmul.f32 %v2207_v26, %v696_v63  ;;  %v953_v22 = vsub.f32 %v566_v2, %v825_v3  ;;  %v708_v61 = vld [vmem:[#allocation7 + $0x240] sm:$0xff]  ;;  %v578_v63 = vmul.f32 %v2205_v25, %v447_v50  ;;  %v450_v2 = vld [vmem:[#allocation5 + $0x248] sm:$0xff] }
  0xa5   :  { %1452 = vst [vmem:[#allocation8 + $0x168] sm:$0xff] %v940_v19  ;;  %v828_v19 = vmul.f32 %v2207_v26, %v697_v4  ;;  %v954_v30 = vsub.f32 %v567_v7, %v826_v8  ;;  %v709_v3 = vld [vmem:[#allocation7 + $0x248] sm:$0xff]  ;;  %v579_v4 = vmul.f32 %v2205_v25, %v448_v55  ;;  %v451_v7 = vld [vmem:[#allocation5 + $0x250] sm:$0xff] }
  0xa6   :  { %1453 = vst [vmem:[#allocation8 + $0x170] sm:$0xff] %v941_v24  ;;  %v829_v24 = vmul.f32 %v2207_v26, %v698_v10  ;;  %v955_v34 = vsub.f32 %v568_v13, %v827_v14  ;;  %v710_v8 = vld [vmem:[#allocation7 + $0x250] sm:$0xff]  ;;  %v580_v10 = vmul.f32 %v2205_v25, %v449_v60  ;;  %v452_v13 = vld [vmem:[#allocation5 + $0x258] sm:$0xff] }
  0xa7   :  { %1454 = vst [vmem:[#allocation8 + $0x178] sm:$0xff] %v942_v1  ;;  %v830_v1 = vmul.f32 %v2207_v26, %v699_v16  ;;  %v956_v38 = vsub.f32 %v569_v18, %v828_v19  ;;  %v711_v14 = vld [vmem:[#allocation7 + $0x258] sm:$0xff]  ;;  %v581_v16 = vmul.f32 %v2205_v25, %v450_v2  ;;  %v453_v18 = vld [vmem:[#allocation5 + $0x260] sm:$0xff] }
  0xa8   :  { %1455 = vst [vmem:[#allocation8 + $0x180] sm:$0xff] %v943_v36  ;;  %v831_v36 = vmul.f32 %v2207_v26, %v700_v21  ;;  %v957_v42 = vsub.f32 %v570_v23, %v829_v24  ;;  %v712_v19 = vld [vmem:[#allocation7 + $0x260] sm:$0xff]  ;;  %v582_v21 = vmul.f32 %v2205_v25, %v451_v7  ;;  %v454_v23 = vld [vmem:[#allocation5 + $0x268] sm:$0xff] }
  0xa9   :  { %1456 = vst [vmem:[#allocation8 + $0x188] sm:$0xff] %v944_v40  ;;  %v832_v40 = vmul.f32 %v2207_v26, %v701_v28  ;;  %v958_v47 = vsub.f32 %v571_v31, %v830_v1  ;;  %v713_v24 = vld [vmem:[#allocation7 + $0x268] sm:$0xff]  ;;  %v583_v28 = vmul.f32 %v2205_v25, %v452_v13  ;;  %v455_v31 = vld [vmem:[#allocation5 + $0x270] sm:$0xff] }
  0xaa   :  { %1457 = vst [vmem:[#allocation8 + $0x190] sm:$0xff] %v945_v44  ;;  %v833_v44 = vmul.f32 %v2207_v26, %v702_v33  ;;  %v959_v52 = vsub.f32 %v572_v35, %v831_v36  ;;  %v714_v1 = vld [vmem:[#allocation7 + $0x270] sm:$0xff]  ;;  %v584_v33 = vmul.f32 %v2205_v25, %v453_v18  ;;  %v456_v35 = vld [vmem:[#allocation5 + $0x278] sm:$0xff] }
  0xab   :  { %1458 = vst [vmem:[#allocation8 + $0x198] sm:$0xff] %v946_v49  ;;  %v834_v49 = vmul.f32 %v2207_v26, %v703_v11  ;;  %v960_v57 = vsub.f32 %v573_v39, %v832_v40  ;;  %v715_v36 = vld [vmem:[#allocation7 + $0x278] sm:$0xff]  ;;  %v585_v11 = vmul.f32 %v2205_v25, %v454_v23  ;;  %v457_v39 = vld [vmem:[#allocation5 + $0x280] sm:$0xff] }
  0xac   :  { %1459 = vst [vmem:[#allocation8 + $0x1a0] sm:$0xff] %v947_v54  ;;  %v835_v54 = vmul.f32 %v2207_v26, %v704_v29  ;;  %v961_v62 = vsub.f32 %v574_v43, %v833_v44  ;;  %v716_v40 = vld [vmem:[#allocation7 + $0x280] sm:$0xff]  ;;  %v586_v29 = vmul.f32 %v2205_v25, %v455_v31  ;;  %v458_v43 = vld [vmem:[#allocation5 + $0x288] sm:$0xff] }
  0xad   :  { %1460 = vst [vmem:[#allocation8 + $0x1a8] sm:$0xff] %v948_v59  ;;  %v836_v59 = vmul.f32 %v2207_v26, %v705_v46  ;;  %v962_v5 = vsub.f32 %v575_v48, %v834_v49  ;;  %v717_v44 = vld [vmem:[#allocation7 + $0x288] sm:$0xff]  ;;  %v587_v46 = vmul.f32 %v2205_v25, %v456_v35  ;;  %v459_v48 = vld [vmem:[#allocation5 + $0x290] sm:$0xff] }
  0xae   :  { %1461 = vst [vmem:[#allocation8 + $0x1b0] sm:$0xff] %v949_v0  ;;  %v837_v0 = vmul.f32 %v2207_v26, %v706_v51  ;;  %v963_v9 = vsub.f32 %v576_v53, %v835_v54  ;;  %v718_v49 = vld [vmem:[#allocation7 + $0x290] sm:$0xff]  ;;  %v588_v51 = vmul.f32 %v2205_v25, %v457_v39  ;;  %v460_v53 = vld [vmem:[#allocation5 + $0x298] sm:$0xff] }
  0xaf   :  { %1462 = vst [vmem:[#allocation8 + $0x1b8] sm:$0xff] %v950_v6  ;;  %v838_v6 = vmul.f32 %v2207_v26, %v707_v56  ;;  %v964_v15 = vsub.f32 %v577_v58, %v836_v59  ;;  %v719_v54 = vld [vmem:[#allocation7 + $0x298] sm:$0xff]  ;;  %v589_v56 = vmul.f32 %v2205_v25, %v458_v43  ;;  %v461_v58 = vld [vmem:[#allocation5 + $0x2a0] sm:$0xff] }
  0xb0   :  { %1463 = vst [vmem:[#allocation8 + $0x1c0] sm:$0xff] %v951_v12  ;;  %v839_v12 = vmul.f32 %v2207_v26, %v708_v61  ;;  %v965_v20 = vsub.f32 %v578_v63, %v837_v0  ;;  %v720_v59 = vld [vmem:[#allocation7 + $0x2a0] sm:$0xff]  ;;  %v590_v61 = vmul.f32 %v2205_v25, %v459_v48  ;;  %v462_v63 = vld [vmem:[#allocation5 + $0x2a8] sm:$0xff] }
  0xb1   :  { %1464 = vst [vmem:[#allocation8 + $0x1c8] sm:$0xff] %v952_v17  ;;  %v840_v17 = vmul.f32 %v2207_v26, %v709_v3  ;;  %v966_v27 = vsub.f32 %v579_v4, %v838_v6  ;;  %v721_v0 = vld [vmem:[#allocation7 + $0x2a8] sm:$0xff]  ;;  %v591_v3 = vmul.f32 %v2205_v25, %v460_v53  ;;  %v463_v4 = vld [vmem:[#allocation5 + $0x2b0] sm:$0xff] }
  0xb2   :  { %1465 = vst [vmem:[#allocation8 + $0x1d0] sm:$0xff] %v953_v22  ;;  %v841_v22 = vmul.f32 %v2207_v26, %v710_v8  ;;  %v967_v32 = vsub.f32 %v580_v10, %v839_v12  ;;  %v722_v6 = vld [vmem:[#allocation7 + $0x2b0] sm:$0xff]  ;;  %v592_v8 = vmul.f32 %v2205_v25, %v461_v58  ;;  %v464_v10 = vld [vmem:[#allocation5 + $0x2b8] sm:$0xff] }
  0xb3   :  { %1466 = vst [vmem:[#allocation8 + $0x1d8] sm:$0xff] %v954_v30  ;;  %v842_v30 = vmul.f32 %v2207_v26, %v711_v14  ;;  %v968_v37 = vsub.f32 %v581_v16, %v840_v17  ;;  %v723_v12 = vld [vmem:[#allocation7 + $0x2b8] sm:$0xff]  ;;  %v593_v14 = vmul.f32 %v2205_v25, %v462_v63  ;;  %v465_v16 = vld [vmem:[#allocation5 + $0x2c0] sm:$0xff] }
  0xb4   :  { %1467 = vst [vmem:[#allocation8 + $0x1e0] sm:$0xff] %v955_v34  ;;  %v843_v34 = vmul.f32 %v2207_v26, %v712_v19  ;;  %v969_v41 = vsub.f32 %v582_v21, %v841_v22  ;;  %v724_v17 = vld [vmem:[#allocation7 + $0x2c0] sm:$0xff]  ;;  %v594_v19 = vmul.f32 %v2205_v25, %v463_v4  ;;  %v466_v21 = vld [vmem:[#allocation5 + $0x2c8] sm:$0xff] }
  0xb5   :  { %1468 = vst [vmem:[#allocation8 + $0x1e8] sm:$0xff] %v956_v38  ;;  %v844_v38 = vmul.f32 %v2207_v26, %v713_v24  ;;  %v970_v45 = vsub.f32 %v583_v28, %v842_v30  ;;  %v725_v22 = vld [vmem:[#allocation7 + $0x2c8] sm:$0xff]  ;;  %v595_v24 = vmul.f32 %v2205_v25, %v464_v10  ;;  %v467_v28 = vld [vmem:[#allocation5 + $0x2d0] sm:$0xff] }
  0xb6   :  { %1469 = vst [vmem:[#allocation8 + $0x1f0] sm:$0xff] %v957_v42  ;;  %v845_v42 = vmul.f32 %v2207_v26, %v714_v1  ;;  %v971_v50 = vsub.f32 %v584_v33, %v843_v34  ;;  %v726_v30 = vld [vmem:[#allocation7 + $0x2d0] sm:$0xff]  ;;  %v596_v1 = vmul.f32 %v2205_v25, %v465_v16  ;;  %v468_v33 = vld [vmem:[#allocation5 + $0x2d8] sm:$0xff] }
  0xb7   :  { %1470 = vst [vmem:[#allocation8 + $0x1f8] sm:$0xff] %v958_v47  ;;  %v846_v47 = vmul.f32 %v2207_v26, %v715_v36  ;;  %v972_v55 = vsub.f32 %v585_v11, %v844_v38  ;;  %v727_v34 = vld [vmem:[#allocation7 + $0x2d8] sm:$0xff]  ;;  %v597_v36 = vmul.f32 %v2205_v25, %v466_v21  ;;  %v469_v11 = vld [vmem:[#allocation5 + $0x2e0] sm:$0xff] }
  0xb8   :  { %1471 = vst [vmem:[#allocation8 + $0x200] sm:$0xff] %v959_v52  ;;  %v847_v52 = vmul.f32 %v2207_v26, %v716_v40  ;;  %v973_v60 = vsub.f32 %v586_v29, %v845_v42  ;;  %v728_v38 = vld [vmem:[#allocation7 + $0x2e0] sm:$0xff]  ;;  %v598_v40 = vmul.f32 %v2205_v25, %v467_v28  ;;  %v470_v29 = vld [vmem:[#allocation5 + $0x2e8] sm:$0xff] }
  0xb9   :  { %1472 = vst [vmem:[#allocation8 + $0x208] sm:$0xff] %v960_v57  ;;  %v848_v57 = vmul.f32 %v2207_v26, %v717_v44  ;;  %v974_v2 = vsub.f32 %v587_v46, %v846_v47  ;;  %v729_v42 = vld [vmem:[#allocation7 + $0x2e8] sm:$0xff]  ;;  %v599_v44 = vmul.f32 %v2205_v25, %v468_v33  ;;  %v471_v46 = vld [vmem:[#allocation5 + $0x2f0] sm:$0xff] }
  0xba   :  { %1473 = vst [vmem:[#allocation8 + $0x210] sm:$0xff] %v961_v62  ;;  %v849_v62 = vmul.f32 %v2207_v26, %v718_v49  ;;  %v975_v7 = vsub.f32 %v588_v51, %v847_v52  ;;  %v730_v47 = vld [vmem:[#allocation7 + $0x2f0] sm:$0xff]  ;;  %v600_v49 = vmul.f32 %v2205_v25, %v469_v11  ;;  %v472_v51 = vld [vmem:[#allocation5 + $0x2f8] sm:$0xff] }
  0xbb   :  { %1474 = vst [vmem:[#allocation8 + $0x218] sm:$0xff] %v962_v5  ;;  %v850_v5 = vmul.f32 %v2207_v26, %v719_v54  ;;  %v976_v13 = vsub.f32 %v589_v56, %v848_v57  ;;  %v731_v52 = vld [vmem:[#allocation7 + $0x2f8] sm:$0xff]  ;;  %v601_v54 = vmul.f32 %v2205_v25, %v470_v29  ;;  %v473_v56 = vld [vmem:[#allocation5 + $0x300] sm:$0xff] }
  0xbc   :  { %1475 = vst [vmem:[#allocation8 + $0x220] sm:$0xff] %v963_v9  ;;  %v851_v9 = vmul.f32 %v2207_v26, %v720_v59  ;;  %v977_v18 = vsub.f32 %v590_v61, %v849_v62  ;;  %v732_v57 = vld [vmem:[#allocation7 + $0x300] sm:$0xff]  ;;  %v602_v59 = vmul.f32 %v2205_v25, %v471_v46  ;;  %v474_v61 = vld [vmem:[#allocation5 + $0x308] sm:$0xff] }
  0xbd   :  { %1476 = vst [vmem:[#allocation8 + $0x228] sm:$0xff] %v964_v15  ;;  %v852_v15 = vmul.f32 %v2207_v26, %v721_v0  ;;  %v978_v23 = vsub.f32 %v591_v3, %v850_v5  ;;  %v733_v62 = vld [vmem:[#allocation7 + $0x308] sm:$0xff]  ;;  %v603_v0 = vmul.f32 %v2205_v25, %v472_v51  ;;  %v475_v3 = vld [vmem:[#allocation5 + $0x310] sm:$0xff] }
  0xbe   :  { %1477 = vst [vmem:[#allocation8 + $0x230] sm:$0xff] %v965_v20  ;;  %v853_v20 = vmul.f32 %v2207_v26, %v722_v6  ;;  %v979_v31 = vsub.f32 %v592_v8, %v851_v9  ;;  %v734_v5 = vld [vmem:[#allocation7 + $0x310] sm:$0xff]  ;;  %v604_v6 = vmul.f32 %v2205_v25, %v473_v56  ;;  %v476_v8 = vld [vmem:[#allocation5 + $0x318] sm:$0xff] }
  0xbf   :  { %1478 = vst [vmem:[#allocation8 + $0x238] sm:$0xff] %v966_v27  ;;  %v854_v27 = vmul.f32 %v2207_v26, %v723_v12  ;;  %v980_v35 = vsub.f32 %v593_v14, %v852_v15  ;;  %v735_v9 = vld [vmem:[#allocation7 + $0x318] sm:$0xff]  ;;  %v605_v12 = vmul.f32 %v2205_v25, %v474_v61  ;;  %v477_v14 = vld [vmem:[#allocation5 + $0x320] sm:$0xff] }
  0xc0   :  { %1479 = vst [vmem:[#allocation8 + $0x240] sm:$0xff] %v967_v32  ;;  %v855_v32 = vmul.f32 %v2207_v26, %v724_v17  ;;  %v981_v39 = vsub.f32 %v594_v19, %v853_v20  ;;  %v736_v15 = vld [vmem:[#allocation7 + $0x320] sm:$0xff]  ;;  %v606_v17 = vmul.f32 %v2205_v25, %v475_v3  ;;  %v478_v19 = vld [vmem:[#allocation5 + $0x328] sm:$0xff] }
  0xc1   :  { %1480 = vst [vmem:[#allocation8 + $0x248] sm:$0xff] %v968_v37  ;;  %v856_v37 = vmul.f32 %v2207_v26, %v725_v22  ;;  %v982_v43 = vsub.f32 %v595_v24, %v854_v27  ;;  %v737_v20 = vld [vmem:[#allocation7 + $0x328] sm:$0xff]  ;;  %v607_v22 = vmul.f32 %v2205_v25, %v476_v8  ;;  %v479_v24 = vld [vmem:[#allocation5 + $0x330] sm:$0xff] }
  0xc2   :  { %1481 = vst [vmem:[#allocation8 + $0x250] sm:$0xff] %v969_v41  ;;  %v857_v41 = vmul.f32 %v2207_v26, %v726_v30  ;;  %v983_v48 = vsub.f32 %v596_v1, %v855_v32  ;;  %v738_v27 = vld [vmem:[#allocation7 + $0x330] sm:$0xff]  ;;  %v608_v30 = vmul.f32 %v2205_v25, %v477_v14  ;;  %v480_v1 = vld [vmem:[#allocation5 + $0x338] sm:$0xff] }
  0xc3   :  { %1482 = vst [vmem:[#allocation8 + $0x258] sm:$0xff] %v970_v45  ;;  %v858_v45 = vmul.f32 %v2207_v26, %v727_v34  ;;  %v984_v53 = vsub.f32 %v597_v36, %v856_v37  ;;  %v739_v32 = vld [vmem:[#allocation7 + $0x338] sm:$0xff]  ;;  %v609_v34 = vmul.f32 %v2205_v25, %v478_v19  ;;  %v481_v36 = vld [vmem:[#allocation5 + $0x340] sm:$0xff] }
  0xc4   :  { %1483 = vst [vmem:[#allocation8 + $0x260] sm:$0xff] %v971_v50  ;;  %v859_v50 = vmul.f32 %v2207_v26, %v728_v38  ;;  %v985_v58 = vsub.f32 %v598_v40, %v857_v41  ;;  %v740_v37 = vld [vmem:[#allocation7 + $0x340] sm:$0xff]  ;;  %v610_v38 = vmul.f32 %v2205_v25, %v479_v24  ;;  %v482_v40 = vld [vmem:[#allocation5 + $0x348] sm:$0xff] }
  0xc5   :  { %1484 = vst [vmem:[#allocation8 + $0x268] sm:$0xff] %v972_v55  ;;  %v860_v55 = vmul.f32 %v2207_v26, %v729_v42  ;;  %v986_v63 = vsub.f32 %v599_v44, %v858_v45  ;;  %v741_v41 = vld [vmem:[#allocation7 + $0x348] sm:$0xff]  ;;  %v611_v42 = vmul.f32 %v2205_v25, %v480_v1  ;;  %v483_v44 = vld [vmem:[#allocation5 + $0x350] sm:$0xff] }
  0xc6   :  { %1485 = vst [vmem:[#allocation8 + $0x270] sm:$0xff] %v973_v60  ;;  %v861_v60 = vmul.f32 %v2207_v26, %v730_v47  ;;  %v987_v4 = vsub.f32 %v600_v49, %v859_v50  ;;  %v742_v45 = vld [vmem:[#allocation7 + $0x350] sm:$0xff]  ;;  %v612_v47 = vmul.f32 %v2205_v25, %v481_v36  ;;  %v484_v49 = vld [vmem:[#allocation5 + $0x358] sm:$0xff] }
  0xc7   :  { %1486 = vst [vmem:[#allocation8 + $0x278] sm:$0xff] %v974_v2  ;;  %v862_v2 = vmul.f32 %v2207_v26, %v731_v52  ;;  %v988_v10 = vsub.f32 %v601_v54, %v860_v55  ;;  %v743_v50 = vld [vmem:[#allocation7 + $0x358] sm:$0xff]  ;;  %v613_v52 = vmul.f32 %v2205_v25, %v482_v40  ;;  %v485_v54 = vld [vmem:[#allocation5 + $0x360] sm:$0xff] }
  0xc8   :  { %1487 = vst [vmem:[#allocation8 + $0x280] sm:$0xff] %v975_v7  ;;  %v863_v7 = vmul.f32 %v2207_v26, %v732_v57  ;;  %v989_v16 = vsub.f32 %v602_v59, %v861_v60  ;;  %v744_v55 = vld [vmem:[#allocation7 + $0x360] sm:$0xff]  ;;  %v614_v57 = vmul.f32 %v2205_v25, %v483_v44  ;;  %v486_v59 = vld [vmem:[#allocation5 + $0x368] sm:$0xff] }
  0xc9   :  { %1488 = vst [vmem:[#allocation8 + $0x288] sm:$0xff] %v976_v13  ;;  %v864_v13 = vmul.f32 %v2207_v26, %v733_v62  ;;  %v990_v21 = vsub.f32 %v603_v0, %v862_v2  ;;  %v745_v60 = vld [vmem:[#allocation7 + $0x368] sm:$0xff]  ;;  %v615_v62 = vmul.f32 %v2205_v25, %v484_v49  ;;  %v487_v0 = vld [vmem:[#allocation5 + $0x370] sm:$0xff] }
  0xca   :  { %1489 = vst [vmem:[#allocation8 + $0x290] sm:$0xff] %v977_v18  ;;  %v865_v18 = vmul.f32 %v2207_v26, %v734_v5  ;;  %v991_v28 = vsub.f32 %v604_v6, %v863_v7  ;;  %v746_v2 = vld [vmem:[#allocation7 + $0x370] sm:$0xff]  ;;  %v616_v5 = vmul.f32 %v2205_v25, %v485_v54  ;;  %v488_v6 = vld [vmem:[#allocation5 + $0x378] sm:$0xff] }
  0xcb   :  { %1490 = vst [vmem:[#allocation8 + $0x298] sm:$0xff] %v978_v23  ;;  %v866_v23 = vmul.f32 %v2207_v26, %v735_v9  ;;  %v992_v33 = vsub.f32 %v605_v12, %v864_v13  ;;  %v747_v7 = vld [vmem:[#allocation7 + $0x378] sm:$0xff]  ;;  %v617_v9 = vmul.f32 %v2205_v25, %v486_v59  ;;  %v489_v12 = vld [vmem:[#allocation5 + $0x380] sm:$0xff] }
  0xcc   :  { %1491 = vst [vmem:[#allocation8 + $0x2a0] sm:$0xff] %v979_v31  ;;  %v867_v31 = vmul.f32 %v2207_v26, %v736_v15  ;;  %v993_v11 = vsub.f32 %v606_v17, %v865_v18  ;;  %v748_v13 = vld [vmem:[#allocation7 + $0x380] sm:$0xff]  ;;  %v618_v15 = vmul.f32 %v2205_v25, %v487_v0  ;;  %v490_v17 = vld [vmem:[#allocation5 + $0x388] sm:$0xff] }
  0xcd   :  { %1492 = vst [vmem:[#allocation8 + $0x2a8] sm:$0xff] %v980_v35  ;;  %v868_v35 = vmul.f32 %v2207_v26, %v737_v20  ;;  %v994_v29 = vsub.f32 %v607_v22, %v866_v23  ;;  %v749_v18 = vld [vmem:[#allocation7 + $0x388] sm:$0xff]  ;;  %v619_v20 = vmul.f32 %v2205_v25, %v488_v6  ;;  %v491_v22 = vld [vmem:[#allocation5 + $0x390] sm:$0xff] }
  0xce   :  { %1493 = vst [vmem:[#allocation8 + $0x2b0] sm:$0xff] %v981_v39  ;;  %v869_v39 = vmul.f32 %v2207_v26, %v738_v27  ;;  %v995_v46 = vsub.f32 %v608_v30, %v867_v31  ;;  %v750_v23 = vld [vmem:[#allocation7 + $0x390] sm:$0xff]  ;;  %v620_v27 = vmul.f32 %v2205_v25, %v489_v12  ;;  %v492_v30 = vld [vmem:[#allocation5 + $0x398] sm:$0xff] }
  0xcf   :  { %1494 = vst [vmem:[#allocation8 + $0x2b8] sm:$0xff] %v982_v43  ;;  %v870_v43 = vmul.f32 %v2207_v26, %v739_v32  ;;  %v996_v51 = vsub.f32 %v609_v34, %v868_v35  ;;  %v751_v31 = vld [vmem:[#allocation7 + $0x398] sm:$0xff]  ;;  %v621_v32 = vmul.f32 %v2205_v25, %v490_v17  ;;  %v493_v34 = vld [vmem:[#allocation5 + $0x3a0] sm:$0xff] }
  0xd0   :  { %1495 = vst [vmem:[#allocation8 + $0x2c0] sm:$0xff] %v983_v48  ;;  %v871_v48 = vmul.f32 %v2207_v26, %v740_v37  ;;  %v997_v56 = vsub.f32 %v610_v38, %v869_v39  ;;  %v752_v35 = vld [vmem:[#allocation7 + $0x3a0] sm:$0xff]  ;;  %v622_v37 = vmul.f32 %v2205_v25, %v491_v22  ;;  %v494_v38 = vld [vmem:[#allocation5 + $0x3a8] sm:$0xff] }
  0xd1   :  { %1496 = vst [vmem:[#allocation8 + $0x2c8] sm:$0xff] %v984_v53  ;;  %v872_v53 = vmul.f32 %v2207_v26, %v741_v41  ;;  %v998_v61 = vsub.f32 %v611_v42, %v870_v43  ;;  %v753_v39 = vld [vmem:[#allocation7 + $0x3a8] sm:$0xff]  ;;  %v623_v41 = vmul.f32 %v2205_v25, %v492_v30  ;;  %v495_v42 = vld [vmem:[#allocation5 + $0x3b0] sm:$0xff] }
  0xd2   :  { %1497 = vst [vmem:[#allocation8 + $0x2d0] sm:$0xff] %v985_v58  ;;  %v873_v58 = vmul.f32 %v2207_v26, %v742_v45  ;;  %v999_v3 = vsub.f32 %v612_v47, %v871_v48  ;;  %v754_v43 = vld [vmem:[#allocation7 + $0x3b0] sm:$0xff]  ;;  %v624_v45 = vmul.f32 %v2205_v25, %v493_v34  ;;  %v496_v47 = vld [vmem:[#allocation5 + $0x3b8] sm:$0xff] }
  0xd3   :  { %1498 = vst [vmem:[#allocation8 + $0x2d8] sm:$0xff] %v986_v63  ;;  %v874_v63 = vmul.f32 %v2207_v26, %v743_v50  ;;  %v1000_v8 = vsub.f32 %v613_v52, %v872_v53  ;;  %v755_v48 = vld [vmem:[#allocation7 + $0x3b8] sm:$0xff]  ;;  %v625_v50 = vmul.f32 %v2205_v25, %v494_v38  ;;  %v497_v52 = vld [vmem:[#allocation5 + $0x3c0] sm:$0xff] }
  0xd4   :  { %1499 = vst [vmem:[#allocation8 + $0x2e0] sm:$0xff] %v987_v4  ;;  %v875_v4 = vmul.f32 %v2207_v26, %v744_v55  ;;  %v1001_v14 = vsub.f32 %v614_v57, %v873_v58  ;;  %v756_v53 = vld [vmem:[#allocation7 + $0x3c0] sm:$0xff]  ;;  %v626_v55 = vmul.f32 %v2205_v25, %v495_v42  ;;  %v498_v57 = vld [vmem:[#allocation5 + $0x3c8] sm:$0xff] }
  0xd5   :  { %1500 = vst [vmem:[#allocation8 + $0x2e8] sm:$0xff] %v988_v10  ;;  %v876_v10 = vmul.f32 %v2207_v26, %v745_v60  ;;  %v1002_v19 = vsub.f32 %v615_v62, %v874_v63  ;;  %v757_v58 = vld [vmem:[#allocation7 + $0x3c8] sm:$0xff]  ;;  %v627_v60 = vmul.f32 %v2205_v25, %v496_v47  ;;  %v499_v62 = vld [vmem:[#allocation5 + $0x3d0] sm:$0xff]  ;;  %v1721_v38 = vld [vmem:[#allocation5] sm:$0xff] }
  0xd6   :  { %1501 = vst [vmem:[#allocation8 + $0x2f0] sm:$0xff] %v989_v16  ;;  %v877_v16 = vmul.f32 %v2207_v26, %v746_v2  ;;  %v1003_v24 = vsub.f32 %v616_v5, %v875_v4  ;;  %v758_v63 = vld [vmem:[#allocation7 + $0x3d0] sm:$0xff]  ;;  %v628_v2 = vmul.f32 %v2205_v25, %v497_v52  ;;  %v500_v5 = vld [vmem:[#allocation5 + $0x3d8] sm:$0xff]  ;;  %v1723_v42 = vld [vmem:[#allocation5 + $0x8] sm:$0xff] }
  0xd7   :  { %1502 = vst [vmem:[#allocation8 + $0x2f8] sm:$0xff] %v990_v21  ;;  %v878_v21 = vmul.f32 %v2207_v26, %v747_v7  ;;  %v1004_v1 = vsub.f32 %v617_v9, %v876_v10  ;;  %v759_v4 = vld [vmem:[#allocation7 + $0x3d8] sm:$0xff]  ;;  %v629_v7 = vmul.f32 %v2205_v25, %v498_v57  ;;  %v501_v9 = vld [vmem:[#allocation5 + $0x3e0] sm:$0xff]  ;;  %v1725_v47 = vld [vmem:[#allocation5 + $0x10] sm:$0xff] }
  0xd8   :  { %1503 = vst [vmem:[#allocation8 + $0x300] sm:$0xff] %v991_v28  ;;  %v879_v28 = vmul.f32 %v2207_v26, %v748_v13  ;;  %v1005_v36 = vsub.f32 %v618_v15, %v877_v16  ;;  %v760_v10 = vld [vmem:[#allocation7 + $0x3e0] sm:$0xff]  ;;  %v630_v13 = vmul.f32 %v2205_v25, %v499_v62  ;;  %v502_v15 = vld [vmem:[#allocation5 + $0x3e8] sm:$0xff]  ;;  %v1727_v52 = vld [vmem:[#allocation5 + $0x18] sm:$0xff] }
  0xd9   :  { %1504 = vst [vmem:[#allocation8 + $0x308] sm:$0xff] %v992_v33  ;;  %v880_v33 = vmul.f32 %v2207_v26, %v749_v18  ;;  %v1006_v40 = vsub.f32 %v619_v20, %v878_v21  ;;  %v761_v16 = vld [vmem:[#allocation7 + $0x3e8] sm:$0xff]  ;;  %v631_v18 = vmul.f32 %v2205_v25, %v500_v5  ;;  %v503_v20 = vld [vmem:[#allocation5 + $0x3f0] sm:$0xff]  ;;  %v1729_v57 = vld [vmem:[#allocation5 + $0x20] sm:$0xff] }
  0xda   :  { %1505 = vst [vmem:[#allocation8 + $0x310] sm:$0xff] %v993_v11  ;;  %v881_v11 = vmul.f32 %v2207_v26, %v750_v23  ;;  %v1007_v44 = vsub.f32 %v620_v27, %v879_v28  ;;  %v762_v21 = vld [vmem:[#allocation7 + $0x3f0] sm:$0xff]  ;;  %v632_v23 = vmul.f32 %v2205_v25, %v501_v9  ;;  %v504_v27 = vld [vmem:[#allocation5 + $0x3f8] sm:$0xff]  ;;  %v1731_v62 = vld [vmem:[#allocation5 + $0x28] sm:$0xff] }
  0xdb   :  { %1506 = vst [vmem:[#allocation8 + $0x318] sm:$0xff] %v994_v29  ;;  %v882_v29 = vmul.f32 %v2207_v26, %v751_v31  ;;  %v1008_v49 = vsub.f32 %v621_v32, %v880_v33  ;;  %v763_v28 = vld [vmem:[#allocation7 + $0x3f8] sm:$0xff]  ;;  %v633_v31 = vmul.f32 %v2205_v25, %v502_v15  ;;  %v634_v33 = vmul.f32 %v2205_v25, %v503_v20  ;;  %v1733_v5 = vld [vmem:[#allocation5 + $0x30] sm:$0xff]  ;;  %v1737_v15 = vld [vmem:[#allocation5 + $0x40] sm:$0xff] }
  0xdc   :  { %1507 = vst [vmem:[#allocation8 + $0x320] sm:$0xff] %v995_v46  ;;  %v883_v46 = vmul.f32 %v2207_v26, %v752_v35  ;;  %v1009_v54 = vsub.f32 %v622_v37, %v881_v11  ;;  %v893_v34 = vmul.f32 %v2207_v26, %v762_v21  ;;  %v894_v37 = vmul.f32 %v2207_v26, %v763_v28  ;;  %v1735_v9 = vld [vmem:[#allocation5 + $0x38] sm:$0xff]  ;;  %v1739_v20 = vld [vmem:[#allocation5 + $0x48] sm:$0xff] }
  0xdd   :  { %1508 = vst [vmem:[#allocation8 + $0x328] sm:$0xff] %v996_v51  ;;  %v884_v51 = vmul.f32 %v2207_v26, %v753_v39  ;;  %v1010_v59 = vsub.f32 %v623_v41, %v882_v29  ;;  %v1023_v39 = vmul.f32 %v1721_v38, %v2207_v26  ;;  %v1032_v21 = vmul.f32 %v1739_v20, %v2207_v26  ;;  %v1746_v38 = vld [vmem:[#allocation7 + $0x60] sm:$0xff]  ;;  %v1764_v20 = vld [vmem:[#allocation7 + $0xa8] sm:$0xff] }
  0xde   :  { %1509 = vst [vmem:[#allocation8 + $0x330] sm:$0xff] %v997_v56  ;;  %v885_v56 = vmul.f32 %v2207_v26, %v754_v43  ;;  %v1011_v0 = vsub.f32 %v624_v45, %v883_v46  ;;  %v1024_v43 = vmul.f32 %v1723_v42, %v2207_v26  ;;  %v1021_v46 = vsub.f32 %v634_v33, %v893_v34  ;;  %v1744_v34 = vld [vmem:[#allocation7 + $0x58] sm:$0xff]  ;;  %v1748_v42 = vld [vmem:[#allocation7 + $0x68] sm:$0xff] }
  0xdf   :  { %1510 = vst [vmem:[#allocation8 + $0x338] sm:$0xff] %v998_v61  ;;  %v886_v61 = vmul.f32 %v2207_v26, %v755_v48  ;;  %v1012_v6 = vsub.f32 %v625_v50, %v884_v51  ;;  %v1025_v48 = vmul.f32 %v1725_v47, %v2207_v26  ;;  %v1750_v47 = vld [vmem:[#allocation7 + $0x70] sm:$0xff] }
  0xe0   :  { %1511 = vst [vmem:[#allocation8 + $0x340] sm:$0xff] %v999_v3  ;;  %v887_v3 = vmul.f32 %v2207_v26, %v756_v53  ;;  %v1013_v12 = vsub.f32 %v626_v55, %v885_v56  ;;  %v1026_v53 = vmul.f32 %v1727_v52, %v2207_v26  ;;  %v1752_v52 = vld [vmem:[#allocation7 + $0x78] sm:$0xff] }
  0xe1   :  { %1512 = vst [vmem:[#allocation8 + $0x348] sm:$0xff] %v1000_v8  ;;  %v888_v8 = vmul.f32 %v2207_v26, %v757_v58  ;;  %v1014_v17 = vsub.f32 %v627_v60, %v886_v61  ;;  %v1027_v58 = vmul.f32 %v1729_v57, %v2207_v26  ;;  %v1754_v57 = vld [vmem:[#allocation7 + $0x80] sm:$0xff] }
  0xe2   :  { %1513 = vst [vmem:[#allocation8 + $0x350] sm:$0xff] %v1001_v14  ;;  %v889_v14 = vmul.f32 %v2207_v26, %v758_v63  ;;  %v1015_v22 = vsub.f32 %v628_v2, %v887_v3  ;;  %v1028_v63 = vmul.f32 %v1731_v62, %v2207_v26  ;;  %v1756_v62 = vld [vmem:[#allocation7 + $0x88] sm:$0xff] }
  0xe3   :  { %1514 = vst [vmem:[#allocation8 + $0x358] sm:$0xff] %v1002_v19  ;;  %v890_v19 = vmul.f32 %v2207_v26, %v759_v4  ;;  %v1016_v30 = vsub.f32 %v629_v7, %v888_v8  ;;  %v1029_v4 = vmul.f32 %v1733_v5, %v2207_v26  ;;  %v1758_v5 = vld [vmem:[#allocation7 + $0x90] sm:$0xff] }
  0xe4   :  { %1515 = vst [vmem:[#allocation8 + $0x360] sm:$0xff] %v1003_v24  ;;  %v891_v24 = vmul.f32 %v2207_v26, %v760_v10  ;;  %v1017_v32 = vsub.f32 %v630_v13, %v889_v14  ;;  %v1030_v10 = vmul.f32 %v1735_v9, %v2207_v26  ;;  %v1760_v9 = vld [vmem:[#allocation7 + $0x98] sm:$0xff] }
  0xe5   :  { %1516 = vst [vmem:[#allocation8 + $0x368] sm:$0xff] %v1004_v1  ;;  %v892_v1 = vmul.f32 %v2207_v26, %v761_v16  ;;  %v1018_v35 = vsub.f32 %v631_v18, %v890_v19  ;;  %v1031_v16 = vmul.f32 %v1737_v15, %v2207_v26  ;;  %v1762_v15 = vld [vmem:[#allocation7 + $0xa0] sm:$0xff] }
  0xe6   :  { %1517 = vst [vmem:[#allocation8 + $0x370] sm:$0xff] %v1005_v36  ;;  %v635_v36 = vmul.f32 %v2205_v25, %v504_v27  ;;  %v1019_v11 = vsub.f32 %v632_v23, %v891_v24  ;;  %v1741_v27 = vld [vmem:[#allocation5 + $0x50] sm:$0xff] }
  0xe7   :  { %1518 = vst [vmem:[#allocation8 + $0x378] sm:$0xff] %v1006_v40  ;;  %v1722_v40 = vld [vmem:[#allocation7] sm:$0xff]  ;;  %v1020_v29 = vsub.f32 %v633_v31, %v892_v1  ;;  %v1033_v28 = vmul.f32 %v1741_v27, %v2207_v26  ;;  %v1766_v27 = vld [vmem:[#allocation7 + $0xb0] sm:$0xff] }
  0xe8   :  { %1519 = vst [vmem:[#allocation8 + $0x380] sm:$0xff] %v1007_v44  ;;  %v1151_v41 = vmul.f32 %v1722_v40, %v2205_v25  ;;  %v1724_v44 = vld [vmem:[#allocation7 + $0x8] sm:$0xff]  ;;  %v1022_v51 = vsub.f32 %v635_v36, %v894_v37  ;;  %v1745_v37 = vld [vmem:[#allocation5 + $0x60] sm:$0xff] }
  0xe9   :  { %1520 = vst [vmem:[#allocation8 + $0x388] sm:$0xff] %v1008_v49  ;;  %v1152_v45 = vmul.f32 %v1724_v44, %v2205_v25  ;;  %v1726_v49 = vld [vmem:[#allocation7 + $0x10] sm:$0xff] }
  0xea   :  { %1521 = vst [vmem:[#allocation8 + $0x390] sm:$0xff] %v1009_v54  ;;  %v1153_v50 = vmul.f32 %v1726_v49, %v2205_v25  ;;  %v1728_v54 = vld [vmem:[#allocation7 + $0x18] sm:$0xff]  ;;  %v1279_v56 = vadd.f32 %v1151_v41, %v1023_v39  ;;  %v1163_v39 = vmul.f32 %v1746_v38, %v2205_v25  ;;  %v1747_v41 = vld [vmem:[#allocation5 + $0x68] sm:$0xff] }
  0xeb   :  { %1522 = vst [vmem:[#allocation8 + $0x398] sm:$0xff] %v1010_v59  ;;  %v1154_v55 = vmul.f32 %v1728_v54, %v2205_v25  ;;  %v1730_v59 = vld [vmem:[#allocation7 + $0x20] sm:$0xff]  ;;  %v1280_v61 = vadd.f32 %v1152_v45, %v1024_v43  ;;  %v1164_v43 = vmul.f32 %v1748_v42, %v2205_v25  ;;  %v1749_v45 = vld [vmem:[#allocation5 + $0x70] sm:$0xff] }
  0xec   :  { %1523 = vst [vmem:[#allocation8 + $0x3a0] sm:$0xff] %v1011_v0  ;;  %v1155_v60 = vmul.f32 %v1730_v59, %v2205_v25  ;;  %v1732_v0 = vld [vmem:[#allocation7 + $0x28] sm:$0xff]  ;;  %v1281_v3 = vadd.f32 %v1153_v50, %v1025_v48  ;;  %v1165_v48 = vmul.f32 %v1750_v47, %v2205_v25  ;;  %v1751_v50 = vld [vmem:[#allocation5 + $0x78] sm:$0xff] }
  0xed   :  { %1524 = vst [vmem:[#allocation8 + $0x3a8] sm:$0xff] %v1012_v6  ;;  %v1156_v2 = vmul.f32 %v1732_v0, %v2205_v25  ;;  %v1734_v6 = vld [vmem:[#allocation7 + $0x30] sm:$0xff]  ;;  %v1282_v8 = vadd.f32 %v1154_v55, %v1026_v53  ;;  %v1166_v53 = vmul.f32 %v1752_v52, %v2205_v25  ;;  %v1753_v55 = vld [vmem:[#allocation5 + $0x80] sm:$0xff] }
  0xee   :  { %1525 = vst [vmem:[#allocation8 + $0x3b0] sm:$0xff] %v1013_v12  ;;  %v1157_v7 = vmul.f32 %v1734_v6, %v2205_v25  ;;  %v1736_v12 = vld [vmem:[#allocation7 + $0x38] sm:$0xff]  ;;  %v1283_v14 = vadd.f32 %v1155_v60, %v1027_v58  ;;  %v1167_v58 = vmul.f32 %v1754_v57, %v2205_v25  ;;  %v1755_v60 = vld [vmem:[#allocation5 + $0x88] sm:$0xff] }
  0xef   :  { %1526 = vst [vmem:[#allocation8 + $0x3b8] sm:$0xff] %v1014_v17  ;;  %v1158_v13 = vmul.f32 %v1736_v12, %v2205_v25  ;;  %v1738_v17 = vld [vmem:[#allocation7 + $0x40] sm:$0xff]  ;;  %v1284_v19 = vadd.f32 %v1156_v2, %v1028_v63  ;;  %v1168_v63 = vmul.f32 %v1756_v62, %v2205_v25  ;;  %v1757_v2 = vld [vmem:[#allocation5 + $0x90] sm:$0xff] }
  0xf0   :  { %1527 = vst [vmem:[#allocation8 + $0x3c0] sm:$0xff] %v1015_v22  ;;  %v1159_v18 = vmul.f32 %v1738_v17, %v2205_v25  ;;  %v1740_v22 = vld [vmem:[#allocation7 + $0x48] sm:$0xff]  ;;  %v1285_v24 = vadd.f32 %v1157_v7, %v1029_v4  ;;  %v1169_v4 = vmul.f32 %v1758_v5, %v2205_v25  ;;  %v1759_v7 = vld [vmem:[#allocation5 + $0x98] sm:$0xff] }
  0xf1   :  { %1528 = vst [vmem:[#allocation8 + $0x3c8] sm:$0xff] %v1016_v30  ;;  %v1160_v23 = vmul.f32 %v1740_v22, %v2205_v25  ;;  %v1742_v30 = vld [vmem:[#allocation7 + $0x50] sm:$0xff]  ;;  %v1286_v1 = vadd.f32 %v1158_v13, %v1030_v10  ;;  %v1170_v10 = vmul.f32 %v1760_v9, %v2205_v25  ;;  %v1761_v13 = vld [vmem:[#allocation5 + $0xa0] sm:$0xff] }
  0xf2   :  { %1529 = vst [vmem:[#allocation8 + $0x3d0] sm:$0xff] %v1017_v32  ;;  %v1161_v31 = vmul.f32 %v1742_v30, %v2205_v25  ;;  %v1743_v32 = vld [vmem:[#allocation5 + $0x58] sm:$0xff]  ;;  %v1287_v36 = vadd.f32 %v1159_v18, %v1031_v16  ;;  %v1171_v16 = vmul.f32 %v1762_v15, %v2205_v25  ;;  %v1763_v18 = vld [vmem:[#allocation5 + $0xa8] sm:$0xff] }
  0xf3   :  { %1530 = vst [vmem:[#allocation8 + $0x3d8] sm:$0xff] %v1018_v35  ;;  %v1034_v33 = vmul.f32 %v1743_v32, %v2207_v26  ;;  %v1162_v35 = vmul.f32 %v1744_v34, %v2205_v25  ;;  %v1288_v40 = vadd.f32 %v1160_v23, %v1032_v21  ;;  %v1172_v21 = vmul.f32 %v1764_v20, %v2205_v25  ;;  %v1765_v23 = vld [vmem:[#allocation5 + $0xb0] sm:$0xff]  ;;  %v1768_v32 = vld [vmem:[#allocation7 + $0xb8] sm:$0xff] }
  0xf4   :  { %1531 = vst [vmem:[#allocation8 + $0x3e0] sm:$0xff] %v1019_v11  ;;  %v1035_v11 = vmul.f32 %v1745_v37, %v2207_v26  ;;  %v1289_v44 = vadd.f32 %v1161_v31, %v1033_v28  ;;  %v1173_v28 = vmul.f32 %v1766_v27, %v2205_v25  ;;  %v1767_v31 = vld [vmem:[#allocation5 + $0xb8] sm:$0xff]  ;;  %v1770_v37 = vld [vmem:[#allocation7 + $0xc0] sm:$0xff] }
  0xf5   :  { %1532 = vst [vmem:[#allocation8 + $0x3e8] sm:$0xff] %v1020_v29  ;;  %v1036_v29 = vmul.f32 %v1747_v41, %v2207_v26  ;;  %v1290_v49 = vadd.f32 %v1162_v35, %v1034_v33  ;;  %v1174_v33 = vmul.f32 %v1768_v32, %v2205_v25  ;;  %v1769_v35 = vld [vmem:[#allocation5 + $0xc0] sm:$0xff]  ;;  %v1772_v41 = vld [vmem:[#allocation7 + $0xc8] sm:$0xff] }
  0xf6   :  { %1533 = vst [vmem:[#allocation8 + $0x3f0] sm:$0xff] %v1021_v46  ;;  %v1037_v46 = vmul.f32 %v1749_v45, %v2207_v26  ;;  %v1291_v54 = vadd.f32 %v1163_v39, %v1035_v11  ;;  %v1175_v11 = vmul.f32 %v1770_v37, %v2205_v25  ;;  %v1771_v39 = vld [vmem:[#allocation5 + $0xc8] sm:$0xff]  ;;  %v1774_v45 = vld [vmem:[#allocation7 + $0xd0] sm:$0xff] }
  0xf7   :  { %1534 = vst [vmem:[#allocation8 + $0x3f8] sm:$0xff] %v1022_v51  ;;  %v1038_v51 = vmul.f32 %v1751_v50, %v2207_v26  ;;  %v1292_v59 = vadd.f32 %v1164_v43, %v1036_v29  ;;  %v1176_v29 = vmul.f32 %v1772_v41, %v2205_v25  ;;  %v1773_v43 = vld [vmem:[#allocation5 + $0xd0] sm:$0xff]  ;;  %v1776_v50 = vld [vmem:[#allocation7 + $0xd8] sm:$0xff] }
  0xf8   :  { %1535 = vst [vmem:[#allocation9] sm:$0xff] %v1279_v56  ;;  %1675 = dma.vmem_to_hbm [thread:$0]  %s1668_s2, 16384, %s1670_s7, [#allocation4], %s2106_s23, %s2106_s23, %s2107_s24   ;;  %v1039_v56 = vmul.f32 %v1753_v55, %v2207_v26  ;;  %v1293_v0 = vadd.f32 %v1165_v48, %v1037_v46  ;;  %v1177_v46 = vmul.f32 %v1774_v45, %v2205_v25  ;;  %v1775_v48 = vld [vmem:[#allocation5 + $0xd8] sm:$0xff]  ;;  %v1778_v55 = vld [vmem:[#allocation7 + $0xe0] sm:$0xff] }
  0xf9   :  { %1536 = vst [vmem:[#allocation9 + $0x8] sm:$0xff] %v1280_v61  ;;  %v1040_v61 = vmul.f32 %v1755_v60, %v2207_v26  ;;  %v1294_v6 = vadd.f32 %v1166_v53, %v1038_v51  ;;  %v1178_v51 = vmul.f32 %v1776_v50, %v2205_v25  ;;  %v1777_v53 = vld [vmem:[#allocation5 + $0xe0] sm:$0xff]  ;;  %v1780_v60 = vld [vmem:[#allocation7 + $0xe8] sm:$0xff] }
  0xfa   :  { %1537 = vst [vmem:[#allocation9 + $0x10] sm:$0xff] %v1281_v3  ;;  %v1041_v3 = vmul.f32 %v1757_v2, %v2207_v26  ;;  %v1295_v12 = vadd.f32 %v1167_v58, %v1039_v56  ;;  %v1179_v56 = vmul.f32 %v1778_v55, %v2205_v25  ;;  %v1779_v58 = vld [vmem:[#allocation5 + $0xe8] sm:$0xff]  ;;  %v1782_v2 = vld [vmem:[#allocation7 + $0xf0] sm:$0xff] }
  0xfb   :  { %1538 = vst [vmem:[#allocation9 + $0x18] sm:$0xff] %v1282_v8  ;;  %v1042_v8 = vmul.f32 %v1759_v7, %v2207_v26  ;;  %v1296_v17 = vadd.f32 %v1168_v63, %v1040_v61  ;;  %v1180_v61 = vmul.f32 %v1780_v60, %v2205_v25  ;;  %v1781_v63 = vld [vmem:[#allocation5 + $0xf0] sm:$0xff]  ;;  %v1784_v7 = vld [vmem:[#allocation7 + $0xf8] sm:$0xff] }
  0xfc   :  { %1539 = vst [vmem:[#allocation9 + $0x20] sm:$0xff] %v1283_v14  ;;  %v1043_v14 = vmul.f32 %v1761_v13, %v2207_v26  ;;  %v1297_v22 = vadd.f32 %v1169_v4, %v1041_v3  ;;  %v1181_v3 = vmul.f32 %v1782_v2, %v2205_v25  ;;  %v1783_v4 = vld [vmem:[#allocation5 + $0xf8] sm:$0xff]  ;;  %v1786_v13 = vld [vmem:[#allocation7 + $0x100] sm:$0xff] }
  0xfd   :  { %1540 = vst [vmem:[#allocation9 + $0x28] sm:$0xff] %v1284_v19  ;;  %v1044_v19 = vmul.f32 %v1763_v18, %v2207_v26  ;;  %v1298_v30 = vadd.f32 %v1170_v10, %v1042_v8  ;;  %v1182_v8 = vmul.f32 %v1784_v7, %v2205_v25  ;;  %v1785_v10 = vld [vmem:[#allocation5 + $0x100] sm:$0xff]  ;;  %v1788_v18 = vld [vmem:[#allocation7 + $0x108] sm:$0xff] }
  0xfe   :  { %1541 = vst [vmem:[#allocation9 + $0x30] sm:$0xff] %v1285_v24  ;;  %v1045_v24 = vmul.f32 %v1765_v23, %v2207_v26  ;;  %v1299_v34 = vadd.f32 %v1171_v16, %v1043_v14  ;;  %v1183_v14 = vmul.f32 %v1786_v13, %v2205_v25  ;;  %v1787_v16 = vld [vmem:[#allocation5 + $0x108] sm:$0xff]  ;;  %v1790_v23 = vld [vmem:[#allocation7 + $0x110] sm:$0xff] }
  0xff   :  { %1542 = vst [vmem:[#allocation9 + $0x38] sm:$0xff] %v1286_v1  ;;  %v1046_v1 = vmul.f32 %v1767_v31, %v2207_v26  ;;  %v1300_v38 = vadd.f32 %v1172_v21, %v1044_v19  ;;  %v1184_v19 = vmul.f32 %v1788_v18, %v2205_v25  ;;  %v1789_v21 = vld [vmem:[#allocation5 + $0x110] sm:$0xff]  ;;  %v1792_v31 = vld [vmem:[#allocation7 + $0x118] sm:$0xff] }
 0x100   :  { %1543 = vst [vmem:[#allocation9 + $0x40] sm:$0xff] %v1287_v36  ;;  %v1047_v36 = vmul.f32 %v1769_v35, %v2207_v26  ;;  %v1301_v42 = vadd.f32 %v1173_v28, %v1045_v24  ;;  %v1185_v24 = vmul.f32 %v1790_v23, %v2205_v25  ;;  %v1791_v28 = vld [vmem:[#allocation5 + $0x118] sm:$0xff]  ;;  %v1794_v35 = vld [vmem:[#allocation7 + $0x120] sm:$0xff] }
 0x101   :  { %1544 = vst [vmem:[#allocation9 + $0x48] sm:$0xff] %v1288_v40  ;;  %v1048_v40 = vmul.f32 %v1771_v39, %v2207_v26  ;;  %v1302_v47 = vadd.f32 %v1174_v33, %v1046_v1  ;;  %v1186_v1 = vmul.f32 %v1792_v31, %v2205_v25  ;;  %v1793_v33 = vld [vmem:[#allocation5 + $0x120] sm:$0xff]  ;;  %v1796_v39 = vld [vmem:[#allocation7 + $0x128] sm:$0xff] }
 0x102   :  { %1545 = vst [vmem:[#allocation9 + $0x50] sm:$0xff] %v1289_v44  ;;  %v1049_v44 = vmul.f32 %v1773_v43, %v2207_v26  ;;  %v1303_v52 = vadd.f32 %v1175_v11, %v1047_v36  ;;  %v1187_v36 = vmul.f32 %v1794_v35, %v2205_v25  ;;  %v1795_v11 = vld [vmem:[#allocation5 + $0x128] sm:$0xff]  ;;  %v1798_v43 = vld [vmem:[#allocation7 + $0x130] sm:$0xff] }
 0x103   :  { %1546 = vst [vmem:[#allocation9 + $0x58] sm:$0xff] %v1290_v49  ;;  %v1050_v49 = vmul.f32 %v1775_v48, %v2207_v26  ;;  %v1304_v57 = vadd.f32 %v1176_v29, %v1048_v40  ;;  %v1188_v40 = vmul.f32 %v1796_v39, %v2205_v25  ;;  %v1797_v29 = vld [vmem:[#allocation5 + $0x130] sm:$0xff]  ;;  %v1800_v48 = vld [vmem:[#allocation7 + $0x138] sm:$0xff] }
 0x104   :  { %1547 = vst [vmem:[#allocation9 + $0x60] sm:$0xff] %v1291_v54  ;;  %v1051_v54 = vmul.f32 %v1777_v53, %v2207_v26  ;;  %v1305_v62 = vadd.f32 %v1177_v46, %v1049_v44  ;;  %v1189_v44 = vmul.f32 %v1798_v43, %v2205_v25  ;;  %v1799_v46 = vld [vmem:[#allocation5 + $0x138] sm:$0xff]  ;;  %v1802_v53 = vld [vmem:[#allocation7 + $0x140] sm:$0xff] }
 0x105   :  { %1548 = vst [vmem:[#allocation9 + $0x68] sm:$0xff] %v1292_v59  ;;  %v1052_v59 = vmul.f32 %v1779_v58, %v2207_v26  ;;  %v1306_v5 = vadd.f32 %v1178_v51, %v1050_v49  ;;  %v1190_v49 = vmul.f32 %v1800_v48, %v2205_v25  ;;  %v1801_v51 = vld [vmem:[#allocation5 + $0x140] sm:$0xff]  ;;  %v1804_v58 = vld [vmem:[#allocation7 + $0x148] sm:$0xff] }
 0x106   :  { %1549 = vst [vmem:[#allocation9 + $0x70] sm:$0xff] %v1293_v0  ;;  %v1053_v0 = vmul.f32 %v1781_v63, %v2207_v26  ;;  %v1307_v9 = vadd.f32 %v1179_v56, %v1051_v54  ;;  %v1191_v54 = vmul.f32 %v1802_v53, %v2205_v25  ;;  %v1803_v56 = vld [vmem:[#allocation5 + $0x148] sm:$0xff]  ;;  %v1806_v63 = vld [vmem:[#allocation7 + $0x150] sm:$0xff] }
 0x107   :  { %1550 = vst [vmem:[#allocation9 + $0x78] sm:$0xff] %v1294_v6  ;;  %v1054_v6 = vmul.f32 %v1783_v4, %v2207_v26  ;;  %v1308_v15 = vadd.f32 %v1180_v61, %v1052_v59  ;;  %v1192_v59 = vmul.f32 %v1804_v58, %v2205_v25  ;;  %v1805_v61 = vld [vmem:[#allocation5 + $0x150] sm:$0xff]  ;;  %v1808_v4 = vld [vmem:[#allocation7 + $0x158] sm:$0xff] }
 0x108   :  { %1551 = vst [vmem:[#allocation9 + $0x80] sm:$0xff] %v1295_v12  ;;  %v1055_v12 = vmul.f32 %v1785_v10, %v2207_v26  ;;  %v1309_v20 = vadd.f32 %v1181_v3, %v1053_v0  ;;  %v1193_v0 = vmul.f32 %v1806_v63, %v2205_v25  ;;  %v1807_v3 = vld [vmem:[#allocation5 + $0x158] sm:$0xff]  ;;  %v1810_v10 = vld [vmem:[#allocation7 + $0x160] sm:$0xff] }
 0x109   :  { %1552 = vst [vmem:[#allocation9 + $0x88] sm:$0xff] %v1296_v17  ;;  %v1056_v17 = vmul.f32 %v1787_v16, %v2207_v26  ;;  %v1310_v27 = vadd.f32 %v1182_v8, %v1054_v6  ;;  %v1194_v6 = vmul.f32 %v1808_v4, %v2205_v25  ;;  %v1809_v8 = vld [vmem:[#allocation5 + $0x160] sm:$0xff]  ;;  %v1812_v16 = vld [vmem:[#allocation7 + $0x168] sm:$0xff] }
 0x10a   :  { %1553 = vst [vmem:[#allocation9 + $0x90] sm:$0xff] %v1297_v22  ;;  %v1057_v22 = vmul.f32 %v1789_v21, %v2207_v26  ;;  %v1311_v32 = vadd.f32 %v1183_v14, %v1055_v12  ;;  %v1195_v12 = vmul.f32 %v1810_v10, %v2205_v25  ;;  %v1811_v14 = vld [vmem:[#allocation5 + $0x168] sm:$0xff]  ;;  %v1814_v21 = vld [vmem:[#allocation7 + $0x170] sm:$0xff] }
 0x10b   :  { %1554 = vst [vmem:[#allocation9 + $0x98] sm:$0xff] %v1298_v30  ;;  %v1058_v30 = vmul.f32 %v1791_v28, %v2207_v26  ;;  %v1312_v37 = vadd.f32 %v1184_v19, %v1056_v17  ;;  %v1196_v17 = vmul.f32 %v1812_v16, %v2205_v25  ;;  %v1813_v19 = vld [vmem:[#allocation5 + $0x170] sm:$0xff]  ;;  %v1816_v28 = vld [vmem:[#allocation7 + $0x178] sm:$0xff] }
 0x10c   :  { %1555 = vst [vmem:[#allocation9 + $0xa0] sm:$0xff] %v1299_v34  ;;  %v1059_v34 = vmul.f32 %v1793_v33, %v2207_v26  ;;  %v1313_v41 = vadd.f32 %v1185_v24, %v1057_v22  ;;  %v1197_v22 = vmul.f32 %v1814_v21, %v2205_v25  ;;  %v1815_v24 = vld [vmem:[#allocation5 + $0x178] sm:$0xff]  ;;  %v1818_v33 = vld [vmem:[#allocation7 + $0x180] sm:$0xff] }
 0x10d   :  { %1556 = vst [vmem:[#allocation9 + $0xa8] sm:$0xff] %v1300_v38  ;;  %v1060_v38 = vmul.f32 %v1795_v11, %v2207_v26  ;;  %v1314_v45 = vadd.f32 %v1186_v1, %v1058_v30  ;;  %v1198_v30 = vmul.f32 %v1816_v28, %v2205_v25  ;;  %v1817_v1 = vld [vmem:[#allocation5 + $0x180] sm:$0xff]  ;;  %v1820_v11 = vld [vmem:[#allocation7 + $0x188] sm:$0xff] }
 0x10e   :  { %1557 = vst [vmem:[#allocation9 + $0xb0] sm:$0xff] %v1301_v42  ;;  %v1061_v42 = vmul.f32 %v1797_v29, %v2207_v26  ;;  %v1315_v50 = vadd.f32 %v1187_v36, %v1059_v34  ;;  %v1199_v34 = vmul.f32 %v1818_v33, %v2205_v25  ;;  %v1819_v36 = vld [vmem:[#allocation5 + $0x188] sm:$0xff]  ;;  %v1822_v29 = vld [vmem:[#allocation7 + $0x190] sm:$0xff] }
 0x10f   :  { %1558 = vst [vmem:[#allocation9 + $0xb8] sm:$0xff] %v1302_v47  ;;  %v1062_v47 = vmul.f32 %v1799_v46, %v2207_v26  ;;  %v1316_v55 = vadd.f32 %v1188_v40, %v1060_v38  ;;  %v1200_v38 = vmul.f32 %v1820_v11, %v2205_v25  ;;  %v1821_v40 = vld [vmem:[#allocation5 + $0x190] sm:$0xff]  ;;  %v1824_v46 = vld [vmem:[#allocation7 + $0x198] sm:$0xff] }
 0x110   :  { %1559 = vst [vmem:[#allocation9 + $0xc0] sm:$0xff] %v1303_v52  ;;  %v1063_v52 = vmul.f32 %v1801_v51, %v2207_v26  ;;  %v1317_v60 = vadd.f32 %v1189_v44, %v1061_v42  ;;  %v1201_v42 = vmul.f32 %v1822_v29, %v2205_v25  ;;  %v1823_v44 = vld [vmem:[#allocation5 + $0x198] sm:$0xff]  ;;  %v1826_v51 = vld [vmem:[#allocation7 + $0x1a0] sm:$0xff] }
 0x111   :  { %1560 = vst [vmem:[#allocation9 + $0xc8] sm:$0xff] %v1304_v57  ;;  %v1064_v57 = vmul.f32 %v1803_v56, %v2207_v26  ;;  %v1318_v2 = vadd.f32 %v1190_v49, %v1062_v47  ;;  %v1202_v47 = vmul.f32 %v1824_v46, %v2205_v25  ;;  %v1825_v49 = vld [vmem:[#allocation5 + $0x1a0] sm:$0xff]  ;;  %v1828_v56 = vld [vmem:[#allocation7 + $0x1a8] sm:$0xff] }
 0x112   :  { %1561 = vst [vmem:[#allocation9 + $0xd0] sm:$0xff] %v1305_v62  ;;  %v1065_v62 = vmul.f32 %v1805_v61, %v2207_v26  ;;  %v1319_v7 = vadd.f32 %v1191_v54, %v1063_v52  ;;  %v1203_v52 = vmul.f32 %v1826_v51, %v2205_v25  ;;  %v1827_v54 = vld [vmem:[#allocation5 + $0x1a8] sm:$0xff]  ;;  %v1830_v61 = vld [vmem:[#allocation7 + $0x1b0] sm:$0xff] }
 0x113   :  { %1562 = vst [vmem:[#allocation9 + $0xd8] sm:$0xff] %v1306_v5  ;;  %v1066_v5 = vmul.f32 %v1807_v3, %v2207_v26  ;;  %v1320_v13 = vadd.f32 %v1192_v59, %v1064_v57  ;;  %v1204_v57 = vmul.f32 %v1828_v56, %v2205_v25  ;;  %v1829_v59 = vld [vmem:[#allocation5 + $0x1b0] sm:$0xff]  ;;  %v1832_v3 = vld [vmem:[#allocation7 + $0x1b8] sm:$0xff] }
 0x114   :  { %1563 = vst [vmem:[#allocation9 + $0xe0] sm:$0xff] %v1307_v9  ;;  %v1067_v9 = vmul.f32 %v1809_v8, %v2207_v26  ;;  %v1321_v18 = vadd.f32 %v1193_v0, %v1065_v62  ;;  %v1205_v62 = vmul.f32 %v1830_v61, %v2205_v25  ;;  %v1831_v0 = vld [vmem:[#allocation5 + $0x1b8] sm:$0xff]  ;;  %v1834_v8 = vld [vmem:[#allocation7 + $0x1c0] sm:$0xff] }
 0x115   :  { %1564 = vst [vmem:[#allocation9 + $0xe8] sm:$0xff] %v1308_v15  ;;  %v1068_v15 = vmul.f32 %v1811_v14, %v2207_v26  ;;  %v1322_v23 = vadd.f32 %v1194_v6, %v1066_v5  ;;  %v1206_v5 = vmul.f32 %v1832_v3, %v2205_v25  ;;  %v1833_v6 = vld [vmem:[#allocation5 + $0x1c0] sm:$0xff]  ;;  %v1836_v14 = vld [vmem:[#allocation7 + $0x1c8] sm:$0xff] }
 0x116   :  { %1565 = vst [vmem:[#allocation9 + $0xf0] sm:$0xff] %v1309_v20  ;;  %v1069_v20 = vmul.f32 %v1813_v19, %v2207_v26  ;;  %v1323_v31 = vadd.f32 %v1195_v12, %v1067_v9  ;;  %v1207_v9 = vmul.f32 %v1834_v8, %v2205_v25  ;;  %v1835_v12 = vld [vmem:[#allocation5 + $0x1c8] sm:$0xff]  ;;  %v1838_v19 = vld [vmem:[#allocation7 + $0x1d0] sm:$0xff] }
 0x117   :  { %1566 = vst [vmem:[#allocation9 + $0xf8] sm:$0xff] %v1310_v27  ;;  %v1070_v27 = vmul.f32 %v1815_v24, %v2207_v26  ;;  %v1324_v35 = vadd.f32 %v1196_v17, %v1068_v15  ;;  %v1208_v15 = vmul.f32 %v1836_v14, %v2205_v25  ;;  %v1837_v17 = vld [vmem:[#allocation5 + $0x1d0] sm:$0xff]  ;;  %v1840_v24 = vld [vmem:[#allocation7 + $0x1d8] sm:$0xff] }
 0x118   :  { %1567 = vst [vmem:[#allocation9 + $0x100] sm:$0xff] %v1311_v32  ;;  %v1071_v32 = vmul.f32 %v1817_v1, %v2207_v26  ;;  %v1325_v39 = vadd.f32 %v1197_v22, %v1069_v20  ;;  %v1209_v20 = vmul.f32 %v1838_v19, %v2205_v25  ;;  %v1839_v22 = vld [vmem:[#allocation5 + $0x1d8] sm:$0xff]  ;;  %v1842_v1 = vld [vmem:[#allocation7 + $0x1e0] sm:$0xff] }
 0x119   :  { %1568 = vst [vmem:[#allocation9 + $0x108] sm:$0xff] %v1312_v37  ;;  %v1072_v37 = vmul.f32 %v1819_v36, %v2207_v26  ;;  %v1326_v43 = vadd.f32 %v1198_v30, %v1070_v27  ;;  %v1210_v27 = vmul.f32 %v1840_v24, %v2205_v25  ;;  %v1841_v30 = vld [vmem:[#allocation5 + $0x1e0] sm:$0xff]  ;;  %v1844_v36 = vld [vmem:[#allocation7 + $0x1e8] sm:$0xff] }
 0x11a   :  { %1569 = vst [vmem:[#allocation9 + $0x110] sm:$0xff] %v1313_v41  ;;  %v1073_v41 = vmul.f32 %v1821_v40, %v2207_v26  ;;  %v1327_v48 = vadd.f32 %v1199_v34, %v1071_v32  ;;  %v1211_v32 = vmul.f32 %v1842_v1, %v2205_v25  ;;  %v1843_v34 = vld [vmem:[#allocation5 + $0x1e8] sm:$0xff]  ;;  %v1846_v40 = vld [vmem:[#allocation7 + $0x1f0] sm:$0xff] }
 0x11b   :  { %1570 = vst [vmem:[#allocation9 + $0x118] sm:$0xff] %v1314_v45  ;;  %v1074_v45 = vmul.f32 %v1823_v44, %v2207_v26  ;;  %v1328_v53 = vadd.f32 %v1200_v38, %v1072_v37  ;;  %v1212_v37 = vmul.f32 %v1844_v36, %v2205_v25  ;;  %v1845_v38 = vld [vmem:[#allocation5 + $0x1f0] sm:$0xff]  ;;  %v1848_v44 = vld [vmem:[#allocation7 + $0x1f8] sm:$0xff] }
 0x11c   :  { %1571 = vst [vmem:[#allocation9 + $0x120] sm:$0xff] %v1315_v50  ;;  %v1075_v50 = vmul.f32 %v1825_v49, %v2207_v26  ;;  %v1329_v58 = vadd.f32 %v1201_v42, %v1073_v41  ;;  %v1213_v41 = vmul.f32 %v1846_v40, %v2205_v25  ;;  %v1847_v42 = vld [vmem:[#allocation5 + $0x1f8] sm:$0xff]  ;;  %v1850_v49 = vld [vmem:[#allocation7 + $0x200] sm:$0xff] }
 0x11d   :  { %1572 = vst [vmem:[#allocation9 + $0x128] sm:$0xff] %v1316_v55  ;;  %v1076_v55 = vmul.f32 %v1827_v54, %v2207_v26  ;;  %v1330_v63 = vadd.f32 %v1202_v47, %v1074_v45  ;;  %v1214_v45 = vmul.f32 %v1848_v44, %v2205_v25  ;;  %v1849_v47 = vld [vmem:[#allocation5 + $0x200] sm:$0xff]  ;;  %v1852_v54 = vld [vmem:[#allocation7 + $0x208] sm:$0xff] }
 0x11e   :  { %1573 = vst [vmem:[#allocation9 + $0x130] sm:$0xff] %v1317_v60  ;;  %v1077_v60 = vmul.f32 %v1829_v59, %v2207_v26  ;;  %v1331_v4 = vadd.f32 %v1203_v52, %v1075_v50  ;;  %v1215_v50 = vmul.f32 %v1850_v49, %v2205_v25  ;;  %v1851_v52 = vld [vmem:[#allocation5 + $0x208] sm:$0xff]  ;;  %v1854_v59 = vld [vmem:[#allocation7 + $0x210] sm:$0xff] }
 0x11f   :  { %1574 = vst [vmem:[#allocation9 + $0x138] sm:$0xff] %v1318_v2  ;;  %v1078_v2 = vmul.f32 %v1831_v0, %v2207_v26  ;;  %v1332_v10 = vadd.f32 %v1204_v57, %v1076_v55  ;;  %v1216_v55 = vmul.f32 %v1852_v54, %v2205_v25  ;;  %v1853_v57 = vld [vmem:[#allocation5 + $0x210] sm:$0xff]  ;;  %v1856_v0 = vld [vmem:[#allocation7 + $0x218] sm:$0xff] }
 0x120   :  { %1575 = vst [vmem:[#allocation9 + $0x140] sm:$0xff] %v1319_v7  ;;  %v1079_v7 = vmul.f32 %v1833_v6, %v2207_v26  ;;  %v1333_v16 = vadd.f32 %v1205_v62, %v1077_v60  ;;  %v1217_v60 = vmul.f32 %v1854_v59, %v2205_v25  ;;  %v1855_v62 = vld [vmem:[#allocation5 + $0x218] sm:$0xff]  ;;  %v1858_v6 = vld [vmem:[#allocation7 + $0x220] sm:$0xff] }
 0x121   :  { %1576 = vst [vmem:[#allocation9 + $0x148] sm:$0xff] %v1320_v13  ;;  %v1080_v13 = vmul.f32 %v1835_v12, %v2207_v26  ;;  %v1334_v21 = vadd.f32 %v1206_v5, %v1078_v2  ;;  %v1218_v2 = vmul.f32 %v1856_v0, %v2205_v25  ;;  %v1857_v5 = vld [vmem:[#allocation5 + $0x220] sm:$0xff]  ;;  %v1860_v12 = vld [vmem:[#allocation7 + $0x228] sm:$0xff] }
 0x122   :  { %1577 = vst [vmem:[#allocation9 + $0x150] sm:$0xff] %v1321_v18  ;;  %v1081_v18 = vmul.f32 %v1837_v17, %v2207_v26  ;;  %v1335_v28 = vadd.f32 %v1207_v9, %v1079_v7  ;;  %v1219_v7 = vmul.f32 %v1858_v6, %v2205_v25  ;;  %v1859_v9 = vld [vmem:[#allocation5 + $0x228] sm:$0xff]  ;;  %v1862_v17 = vld [vmem:[#allocation7 + $0x230] sm:$0xff] }
 0x123   :  { %1578 = vst [vmem:[#allocation9 + $0x158] sm:$0xff] %v1322_v23  ;;  %v1082_v23 = vmul.f32 %v1839_v22, %v2207_v26  ;;  %v1336_v33 = vadd.f32 %v1208_v15, %v1080_v13  ;;  %v1220_v13 = vmul.f32 %v1860_v12, %v2205_v25  ;;  %v1861_v15 = vld [vmem:[#allocation5 + $0x230] sm:$0xff]  ;;  %v1864_v22 = vld [vmem:[#allocation7 + $0x238] sm:$0xff] }
 0x124   :  { %1579 = vst [vmem:[#allocation9 + $0x160] sm:$0xff] %v1323_v31  ;;  %v1083_v31 = vmul.f32 %v1841_v30, %v2207_v26  ;;  %v1337_v11 = vadd.f32 %v1209_v20, %v1081_v18  ;;  %v1221_v18 = vmul.f32 %v1862_v17, %v2205_v25  ;;  %v1863_v20 = vld [vmem:[#allocation5 + $0x238] sm:$0xff]  ;;  %v1866_v30 = vld [vmem:[#allocation7 + $0x240] sm:$0xff] }
 0x125   :  { %1580 = vst [vmem:[#allocation9 + $0x168] sm:$0xff] %v1324_v35  ;;  %v1084_v35 = vmul.f32 %v1843_v34, %v2207_v26  ;;  %v1338_v29 = vadd.f32 %v1210_v27, %v1082_v23  ;;  %v1222_v23 = vmul.f32 %v1864_v22, %v2205_v25  ;;  %v1865_v27 = vld [vmem:[#allocation5 + $0x240] sm:$0xff]  ;;  %v1868_v34 = vld [vmem:[#allocation7 + $0x248] sm:$0xff] }
 0x126   :  { %1581 = vst [vmem:[#allocation9 + $0x170] sm:$0xff] %v1325_v39  ;;  %v1085_v39 = vmul.f32 %v1845_v38, %v2207_v26  ;;  %v1339_v46 = vadd.f32 %v1211_v32, %v1083_v31  ;;  %v1223_v31 = vmul.f32 %v1866_v30, %v2205_v25  ;;  %v1867_v32 = vld [vmem:[#allocation5 + $0x248] sm:$0xff]  ;;  %v1870_v38 = vld [vmem:[#allocation7 + $0x250] sm:$0xff] }
 0x127   :  { %1582 = vst [vmem:[#allocation9 + $0x178] sm:$0xff] %v1326_v43  ;;  %v1086_v43 = vmul.f32 %v1847_v42, %v2207_v26  ;;  %v1340_v51 = vadd.f32 %v1212_v37, %v1084_v35  ;;  %v1224_v35 = vmul.f32 %v1868_v34, %v2205_v25  ;;  %v1869_v37 = vld [vmem:[#allocation5 + $0x250] sm:$0xff]  ;;  %v1872_v42 = vld [vmem:[#allocation7 + $0x258] sm:$0xff] }
 0x128   :  { %1583 = vst [vmem:[#allocation9 + $0x180] sm:$0xff] %v1327_v48  ;;  %v1087_v48 = vmul.f32 %v1849_v47, %v2207_v26  ;;  %v1341_v56 = vadd.f32 %v1213_v41, %v1085_v39  ;;  %v1225_v39 = vmul.f32 %v1870_v38, %v2205_v25  ;;  %v1871_v41 = vld [vmem:[#allocation5 + $0x258] sm:$0xff]  ;;  %v1874_v47 = vld [vmem:[#allocation7 + $0x260] sm:$0xff] }
 0x129   :  { %1584 = vst [vmem:[#allocation9 + $0x188] sm:$0xff] %v1328_v53  ;;  %v1088_v53 = vmul.f32 %v1851_v52, %v2207_v26  ;;  %v1342_v61 = vadd.f32 %v1214_v45, %v1086_v43  ;;  %v1226_v43 = vmul.f32 %v1872_v42, %v2205_v25  ;;  %v1873_v45 = vld [vmem:[#allocation5 + $0x260] sm:$0xff]  ;;  %v1876_v52 = vld [vmem:[#allocation7 + $0x268] sm:$0xff] }
 0x12a   :  { %1585 = vst [vmem:[#allocation9 + $0x190] sm:$0xff] %v1329_v58  ;;  %v1089_v58 = vmul.f32 %v1853_v57, %v2207_v26  ;;  %v1343_v3 = vadd.f32 %v1215_v50, %v1087_v48  ;;  %v1227_v48 = vmul.f32 %v1874_v47, %v2205_v25  ;;  %v1875_v50 = vld [vmem:[#allocation5 + $0x268] sm:$0xff]  ;;  %v1878_v57 = vld [vmem:[#allocation7 + $0x270] sm:$0xff] }
 0x12b   :  { %1586 = vst [vmem:[#allocation9 + $0x198] sm:$0xff] %v1330_v63  ;;  %v1090_v63 = vmul.f32 %v1855_v62, %v2207_v26  ;;  %v1344_v8 = vadd.f32 %v1216_v55, %v1088_v53  ;;  %v1228_v53 = vmul.f32 %v1876_v52, %v2205_v25  ;;  %v1877_v55 = vld [vmem:[#allocation5 + $0x270] sm:$0xff]  ;;  %v1880_v62 = vld [vmem:[#allocation7 + $0x278] sm:$0xff] }
 0x12c   :  { %1587 = vst [vmem:[#allocation9 + $0x1a0] sm:$0xff] %v1331_v4  ;;  %v1091_v4 = vmul.f32 %v1857_v5, %v2207_v26  ;;  %v1345_v14 = vadd.f32 %v1217_v60, %v1089_v58  ;;  %v1229_v58 = vmul.f32 %v1878_v57, %v2205_v25  ;;  %v1879_v60 = vld [vmem:[#allocation5 + $0x278] sm:$0xff]  ;;  %v1882_v5 = vld [vmem:[#allocation7 + $0x280] sm:$0xff] }
 0x12d   :  { %1588 = vst [vmem:[#allocation9 + $0x1a8] sm:$0xff] %v1332_v10  ;;  %v1092_v10 = vmul.f32 %v1859_v9, %v2207_v26  ;;  %v1346_v19 = vadd.f32 %v1218_v2, %v1090_v63  ;;  %v1230_v63 = vmul.f32 %v1880_v62, %v2205_v25  ;;  %v1881_v2 = vld [vmem:[#allocation5 + $0x280] sm:$0xff]  ;;  %v1884_v9 = vld [vmem:[#allocation7 + $0x288] sm:$0xff] }
 0x12e   :  { %1589 = vst [vmem:[#allocation9 + $0x1b0] sm:$0xff] %v1333_v16  ;;  %v1093_v16 = vmul.f32 %v1861_v15, %v2207_v26  ;;  %v1347_v24 = vadd.f32 %v1219_v7, %v1091_v4  ;;  %v1231_v4 = vmul.f32 %v1882_v5, %v2205_v25  ;;  %v1883_v7 = vld [vmem:[#allocation5 + $0x288] sm:$0xff]  ;;  %v1886_v15 = vld [vmem:[#allocation7 + $0x290] sm:$0xff] }
 0x12f   :  { %1590 = vst [vmem:[#allocation9 + $0x1b8] sm:$0xff] %v1334_v21  ;;  %v1094_v21 = vmul.f32 %v1863_v20, %v2207_v26  ;;  %v1348_v1 = vadd.f32 %v1220_v13, %v1092_v10  ;;  %v1232_v10 = vmul.f32 %v1884_v9, %v2205_v25  ;;  %v1885_v13 = vld [vmem:[#allocation5 + $0x290] sm:$0xff]  ;;  %v1888_v20 = vld [vmem:[#allocation7 + $0x298] sm:$0xff] }
 0x130   :  { %1591 = vst [vmem:[#allocation9 + $0x1c0] sm:$0xff] %v1335_v28  ;;  %v1095_v28 = vmul.f32 %v1865_v27, %v2207_v26  ;;  %v1349_v36 = vadd.f32 %v1221_v18, %v1093_v16  ;;  %v1233_v16 = vmul.f32 %v1886_v15, %v2205_v25  ;;  %v1887_v18 = vld [vmem:[#allocation5 + $0x298] sm:$0xff]  ;;  %v1890_v27 = vld [vmem:[#allocation7 + $0x2a0] sm:$0xff] }
 0x131   :  { %1592 = vst [vmem:[#allocation9 + $0x1c8] sm:$0xff] %v1336_v33  ;;  %v1096_v33 = vmul.f32 %v1867_v32, %v2207_v26  ;;  %v1350_v40 = vadd.f32 %v1222_v23, %v1094_v21  ;;  %v1234_v21 = vmul.f32 %v1888_v20, %v2205_v25  ;;  %v1889_v23 = vld [vmem:[#allocation5 + $0x2a0] sm:$0xff]  ;;  %v1892_v32 = vld [vmem:[#allocation7 + $0x2a8] sm:$0xff] }
 0x132   :  { %1593 = vst [vmem:[#allocation9 + $0x1d0] sm:$0xff] %v1337_v11  ;;  %v1097_v11 = vmul.f32 %v1869_v37, %v2207_v26  ;;  %v1351_v44 = vadd.f32 %v1223_v31, %v1095_v28  ;;  %v1235_v28 = vmul.f32 %v1890_v27, %v2205_v25  ;;  %v1891_v31 = vld [vmem:[#allocation5 + $0x2a8] sm:$0xff]  ;;  %v1894_v37 = vld [vmem:[#allocation7 + $0x2b0] sm:$0xff] }
 0x133   :  { %1594 = vst [vmem:[#allocation9 + $0x1d8] sm:$0xff] %v1338_v29  ;;  %v1098_v29 = vmul.f32 %v1871_v41, %v2207_v26  ;;  %v1352_v49 = vadd.f32 %v1224_v35, %v1096_v33  ;;  %v1236_v33 = vmul.f32 %v1892_v32, %v2205_v25  ;;  %v1893_v35 = vld [vmem:[#allocation5 + $0x2b0] sm:$0xff]  ;;  %v1896_v41 = vld [vmem:[#allocation7 + $0x2b8] sm:$0xff] }
 0x134   :  { %1595 = vst [vmem:[#allocation9 + $0x1e0] sm:$0xff] %v1339_v46  ;;  %v1099_v46 = vmul.f32 %v1873_v45, %v2207_v26  ;;  %v1353_v54 = vadd.f32 %v1225_v39, %v1097_v11  ;;  %v1237_v11 = vmul.f32 %v1894_v37, %v2205_v25  ;;  %v1895_v39 = vld [vmem:[#allocation5 + $0x2b8] sm:$0xff]  ;;  %v1898_v45 = vld [vmem:[#allocation7 + $0x2c0] sm:$0xff] }
 0x135   :  { %1596 = vst [vmem:[#allocation9 + $0x1e8] sm:$0xff] %v1340_v51  ;;  %v1100_v51 = vmul.f32 %v1875_v50, %v2207_v26  ;;  %v1354_v59 = vadd.f32 %v1226_v43, %v1098_v29  ;;  %v1238_v29 = vmul.f32 %v1896_v41, %v2205_v25  ;;  %v1897_v43 = vld [vmem:[#allocation5 + $0x2c0] sm:$0xff]  ;;  %v1900_v50 = vld [vmem:[#allocation7 + $0x2c8] sm:$0xff] }
 0x136   :  { %1597 = vst [vmem:[#allocation9 + $0x1f0] sm:$0xff] %v1341_v56  ;;  %v1101_v56 = vmul.f32 %v1877_v55, %v2207_v26  ;;  %v1355_v0 = vadd.f32 %v1227_v48, %v1099_v46  ;;  %v1239_v46 = vmul.f32 %v1898_v45, %v2205_v25  ;;  %v1899_v48 = vld [vmem:[#allocation5 + $0x2c8] sm:$0xff]  ;;  %v1902_v55 = vld [vmem:[#allocation7 + $0x2d0] sm:$0xff] }
 0x137   :  { %1598 = vst [vmem:[#allocation9 + $0x1f8] sm:$0xff] %v1342_v61  ;;  %v1102_v61 = vmul.f32 %v1879_v60, %v2207_v26  ;;  %v1356_v6 = vadd.f32 %v1228_v53, %v1100_v51  ;;  %v1240_v51 = vmul.f32 %v1900_v50, %v2205_v25  ;;  %v1901_v53 = vld [vmem:[#allocation5 + $0x2d0] sm:$0xff]  ;;  %v1904_v60 = vld [vmem:[#allocation7 + $0x2d8] sm:$0xff] }
 0x138   :  { %1599 = vst [vmem:[#allocation9 + $0x200] sm:$0xff] %v1343_v3  ;;  %v1103_v3 = vmul.f32 %v1881_v2, %v2207_v26  ;;  %v1357_v12 = vadd.f32 %v1229_v58, %v1101_v56  ;;  %v1241_v56 = vmul.f32 %v1902_v55, %v2205_v25  ;;  %v1903_v58 = vld [vmem:[#allocation5 + $0x2d8] sm:$0xff]  ;;  %v1906_v2 = vld [vmem:[#allocation7 + $0x2e0] sm:$0xff] }
 0x139   :  { %1600 = vst [vmem:[#allocation9 + $0x208] sm:$0xff] %v1344_v8  ;;  %v1104_v8 = vmul.f32 %v1883_v7, %v2207_v26  ;;  %v1358_v17 = vadd.f32 %v1230_v63, %v1102_v61  ;;  %v1242_v61 = vmul.f32 %v1904_v60, %v2205_v25  ;;  %v1905_v63 = vld [vmem:[#allocation5 + $0x2e0] sm:$0xff]  ;;  %v1908_v7 = vld [vmem:[#allocation7 + $0x2e8] sm:$0xff] }
 0x13a   :  { %1601 = vst [vmem:[#allocation9 + $0x210] sm:$0xff] %v1345_v14  ;;  %v1105_v14 = vmul.f32 %v1885_v13, %v2207_v26  ;;  %v1359_v22 = vadd.f32 %v1231_v4, %v1103_v3  ;;  %v1243_v3 = vmul.f32 %v1906_v2, %v2205_v25  ;;  %v1907_v4 = vld [vmem:[#allocation5 + $0x2e8] sm:$0xff]  ;;  %v1910_v13 = vld [vmem:[#allocation7 + $0x2f0] sm:$0xff] }
 0x13b   :  { %1602 = vst [vmem:[#allocation9 + $0x218] sm:$0xff] %v1346_v19  ;;  %v1106_v19 = vmul.f32 %v1887_v18, %v2207_v26  ;;  %v1360_v30 = vadd.f32 %v1232_v10, %v1104_v8  ;;  %v1244_v8 = vmul.f32 %v1908_v7, %v2205_v25  ;;  %v1909_v10 = vld [vmem:[#allocation5 + $0x2f0] sm:$0xff]  ;;  %v1912_v18 = vld [vmem:[#allocation7 + $0x2f8] sm:$0xff] }
 0x13c   :  { %1603 = vst [vmem:[#allocation9 + $0x220] sm:$0xff] %v1347_v24  ;;  %v1107_v24 = vmul.f32 %v1889_v23, %v2207_v26  ;;  %v1361_v34 = vadd.f32 %v1233_v16, %v1105_v14  ;;  %v1245_v14 = vmul.f32 %v1910_v13, %v2205_v25  ;;  %v1911_v16 = vld [vmem:[#allocation5 + $0x2f8] sm:$0xff]  ;;  %v1914_v23 = vld [vmem:[#allocation7 + $0x300] sm:$0xff] }
 0x13d   :  { %1604 = vst [vmem:[#allocation9 + $0x228] sm:$0xff] %v1348_v1  ;;  %v1108_v1 = vmul.f32 %v1891_v31, %v2207_v26  ;;  %v1362_v38 = vadd.f32 %v1234_v21, %v1106_v19  ;;  %v1246_v19 = vmul.f32 %v1912_v18, %v2205_v25  ;;  %v1913_v21 = vld [vmem:[#allocation5 + $0x300] sm:$0xff]  ;;  %v1916_v31 = vld [vmem:[#allocation7 + $0x308] sm:$0xff] }
 0x13e   :  { %1605 = vst [vmem:[#allocation9 + $0x230] sm:$0xff] %v1349_v36  ;;  %v1109_v36 = vmul.f32 %v1893_v35, %v2207_v26  ;;  %v1363_v42 = vadd.f32 %v1235_v28, %v1107_v24  ;;  %v1247_v24 = vmul.f32 %v1914_v23, %v2205_v25  ;;  %v1915_v28 = vld [vmem:[#allocation5 + $0x308] sm:$0xff]  ;;  %v1918_v35 = vld [vmem:[#allocation7 + $0x310] sm:$0xff] }
 0x13f   :  { %1606 = vst [vmem:[#allocation9 + $0x238] sm:$0xff] %v1350_v40  ;;  %v1110_v40 = vmul.f32 %v1895_v39, %v2207_v26  ;;  %v1364_v47 = vadd.f32 %v1236_v33, %v1108_v1  ;;  %v1248_v1 = vmul.f32 %v1916_v31, %v2205_v25  ;;  %v1917_v33 = vld [vmem:[#allocation5 + $0x310] sm:$0xff]  ;;  %v1920_v39 = vld [vmem:[#allocation7 + $0x318] sm:$0xff] }
 0x140   :  { %1607 = vst [vmem:[#allocation9 + $0x240] sm:$0xff] %v1351_v44  ;;  %v1111_v44 = vmul.f32 %v1897_v43, %v2207_v26  ;;  %v1365_v52 = vadd.f32 %v1237_v11, %v1109_v36  ;;  %v1249_v36 = vmul.f32 %v1918_v35, %v2205_v25  ;;  %v1919_v11 = vld [vmem:[#allocation5 + $0x318] sm:$0xff]  ;;  %v1922_v43 = vld [vmem:[#allocation7 + $0x320] sm:$0xff] }
 0x141   :  { %1608 = vst [vmem:[#allocation9 + $0x248] sm:$0xff] %v1352_v49  ;;  %v1112_v49 = vmul.f32 %v1899_v48, %v2207_v26  ;;  %v1366_v57 = vadd.f32 %v1238_v29, %v1110_v40  ;;  %v1250_v40 = vmul.f32 %v1920_v39, %v2205_v25  ;;  %v1921_v29 = vld [vmem:[#allocation5 + $0x320] sm:$0xff]  ;;  %v1924_v48 = vld [vmem:[#allocation7 + $0x328] sm:$0xff] }
 0x142   :  { %1609 = vst [vmem:[#allocation9 + $0x250] sm:$0xff] %v1353_v54  ;;  %v1113_v54 = vmul.f32 %v1901_v53, %v2207_v26  ;;  %v1367_v62 = vadd.f32 %v1239_v46, %v1111_v44  ;;  %v1251_v44 = vmul.f32 %v1922_v43, %v2205_v25  ;;  %v1923_v46 = vld [vmem:[#allocation5 + $0x328] sm:$0xff]  ;;  %v1926_v53 = vld [vmem:[#allocation7 + $0x330] sm:$0xff] }
 0x143   :  { %1610 = vst [vmem:[#allocation9 + $0x258] sm:$0xff] %v1354_v59  ;;  %v1114_v59 = vmul.f32 %v1903_v58, %v2207_v26  ;;  %v1368_v5 = vadd.f32 %v1240_v51, %v1112_v49  ;;  %v1252_v49 = vmul.f32 %v1924_v48, %v2205_v25  ;;  %v1925_v51 = vld [vmem:[#allocation5 + $0x330] sm:$0xff]  ;;  %v1928_v58 = vld [vmem:[#allocation7 + $0x338] sm:$0xff] }
 0x144   :  { %1611 = vst [vmem:[#allocation9 + $0x260] sm:$0xff] %v1355_v0  ;;  %v1115_v0 = vmul.f32 %v1905_v63, %v2207_v26  ;;  %v1369_v9 = vadd.f32 %v1241_v56, %v1113_v54  ;;  %v1253_v54 = vmul.f32 %v1926_v53, %v2205_v25  ;;  %v1927_v56 = vld [vmem:[#allocation5 + $0x338] sm:$0xff]  ;;  %v1930_v63 = vld [vmem:[#allocation7 + $0x340] sm:$0xff] }
 0x145   :  { %1612 = vst [vmem:[#allocation9 + $0x268] sm:$0xff] %v1356_v6  ;;  %v1116_v6 = vmul.f32 %v1907_v4, %v2207_v26  ;;  %v1370_v15 = vadd.f32 %v1242_v61, %v1114_v59  ;;  %v1254_v59 = vmul.f32 %v1928_v58, %v2205_v25  ;;  %v1929_v61 = vld [vmem:[#allocation5 + $0x340] sm:$0xff]  ;;  %v1932_v4 = vld [vmem:[#allocation7 + $0x348] sm:$0xff] }
 0x146   :  { %1613 = vst [vmem:[#allocation9 + $0x270] sm:$0xff] %v1357_v12  ;;  %v1117_v12 = vmul.f32 %v1909_v10, %v2207_v26  ;;  %v1371_v20 = vadd.f32 %v1243_v3, %v1115_v0  ;;  %v1255_v0 = vmul.f32 %v1930_v63, %v2205_v25  ;;  %v1931_v3 = vld [vmem:[#allocation5 + $0x348] sm:$0xff]  ;;  %v1934_v10 = vld [vmem:[#allocation7 + $0x350] sm:$0xff] }
 0x147   :  { %1614 = vst [vmem:[#allocation9 + $0x278] sm:$0xff] %v1358_v17  ;;  %v1118_v17 = vmul.f32 %v1911_v16, %v2207_v26  ;;  %v1372_v27 = vadd.f32 %v1244_v8, %v1116_v6  ;;  %v1256_v6 = vmul.f32 %v1932_v4, %v2205_v25  ;;  %v1933_v8 = vld [vmem:[#allocation5 + $0x350] sm:$0xff]  ;;  %v1936_v16 = vld [vmem:[#allocation7 + $0x358] sm:$0xff] }
 0x148   :  { %1615 = vst [vmem:[#allocation9 + $0x280] sm:$0xff] %v1359_v22  ;;  %v1119_v22 = vmul.f32 %v1913_v21, %v2207_v26  ;;  %v1373_v32 = vadd.f32 %v1245_v14, %v1117_v12  ;;  %v1257_v12 = vmul.f32 %v1934_v10, %v2205_v25  ;;  %v1935_v14 = vld [vmem:[#allocation5 + $0x358] sm:$0xff]  ;;  %v1938_v21 = vld [vmem:[#allocation7 + $0x360] sm:$0xff] }
 0x149   :  { %1616 = vst [vmem:[#allocation9 + $0x288] sm:$0xff] %v1360_v30  ;;  %v1120_v30 = vmul.f32 %v1915_v28, %v2207_v26  ;;  %v1374_v37 = vadd.f32 %v1246_v19, %v1118_v17  ;;  %v1258_v17 = vmul.f32 %v1936_v16, %v2205_v25  ;;  %v1937_v19 = vld [vmem:[#allocation5 + $0x360] sm:$0xff]  ;;  %v1940_v28 = vld [vmem:[#allocation7 + $0x368] sm:$0xff] }
 0x14a   :  { %1617 = vst [vmem:[#allocation9 + $0x290] sm:$0xff] %v1361_v34  ;;  %v1121_v34 = vmul.f32 %v1917_v33, %v2207_v26  ;;  %v1375_v41 = vadd.f32 %v1247_v24, %v1119_v22  ;;  %v1259_v22 = vmul.f32 %v1938_v21, %v2205_v25  ;;  %v1939_v24 = vld [vmem:[#allocation5 + $0x368] sm:$0xff]  ;;  %v1942_v33 = vld [vmem:[#allocation7 + $0x370] sm:$0xff] }
 0x14b   :  { %1618 = vst [vmem:[#allocation9 + $0x298] sm:$0xff] %v1362_v38  ;;  %v1122_v38 = vmul.f32 %v1919_v11, %v2207_v26  ;;  %v1376_v45 = vadd.f32 %v1248_v1, %v1120_v30  ;;  %v1260_v30 = vmul.f32 %v1940_v28, %v2205_v25  ;;  %v1941_v1 = vld [vmem:[#allocation5 + $0x370] sm:$0xff]  ;;  %v1944_v11 = vld [vmem:[#allocation7 + $0x378] sm:$0xff] }
 0x14c   :  { %1619 = vst [vmem:[#allocation9 + $0x2a0] sm:$0xff] %v1363_v42  ;;  %v1123_v42 = vmul.f32 %v1921_v29, %v2207_v26  ;;  %v1377_v50 = vadd.f32 %v1249_v36, %v1121_v34  ;;  %v1261_v34 = vmul.f32 %v1942_v33, %v2205_v25  ;;  %v1943_v36 = vld [vmem:[#allocation5 + $0x378] sm:$0xff]  ;;  %v1946_v29 = vld [vmem:[#allocation7 + $0x380] sm:$0xff] }
 0x14d   :  { %1620 = vst [vmem:[#allocation9 + $0x2a8] sm:$0xff] %v1364_v47  ;;  %v1124_v47 = vmul.f32 %v1923_v46, %v2207_v26  ;;  %v1378_v55 = vadd.f32 %v1250_v40, %v1122_v38  ;;  %v1262_v38 = vmul.f32 %v1944_v11, %v2205_v25  ;;  %v1945_v40 = vld [vmem:[#allocation5 + $0x380] sm:$0xff]  ;;  %v1948_v46 = vld [vmem:[#allocation7 + $0x388] sm:$0xff] }
 0x14e   :  { %1621 = vst [vmem:[#allocation9 + $0x2b0] sm:$0xff] %v1365_v52  ;;  %v1125_v52 = vmul.f32 %v1925_v51, %v2207_v26  ;;  %v1379_v60 = vadd.f32 %v1251_v44, %v1123_v42  ;;  %v1263_v42 = vmul.f32 %v1946_v29, %v2205_v25  ;;  %v1947_v44 = vld [vmem:[#allocation5 + $0x388] sm:$0xff]  ;;  %v1950_v51 = vld [vmem:[#allocation7 + $0x390] sm:$0xff] }
 0x14f   :  { %1622 = vst [vmem:[#allocation9 + $0x2b8] sm:$0xff] %v1366_v57  ;;  %v1126_v57 = vmul.f32 %v1927_v56, %v2207_v26  ;;  %v1380_v2 = vadd.f32 %v1252_v49, %v1124_v47  ;;  %v1264_v47 = vmul.f32 %v1948_v46, %v2205_v25  ;;  %v1949_v49 = vld [vmem:[#allocation5 + $0x390] sm:$0xff]  ;;  %v1952_v56 = vld [vmem:[#allocation7 + $0x398] sm:$0xff] }
 0x150   :  { %1623 = vst [vmem:[#allocation9 + $0x2c0] sm:$0xff] %v1367_v62  ;;  %v1127_v62 = vmul.f32 %v1929_v61, %v2207_v26  ;;  %v1381_v7 = vadd.f32 %v1253_v54, %v1125_v52  ;;  %v1265_v52 = vmul.f32 %v1950_v51, %v2205_v25  ;;  %v1951_v54 = vld [vmem:[#allocation5 + $0x398] sm:$0xff]  ;;  %v1954_v61 = vld [vmem:[#allocation7 + $0x3a0] sm:$0xff] }
 0x151   :  { %1624 = vst [vmem:[#allocation9 + $0x2c8] sm:$0xff] %v1368_v5  ;;  %v1128_v5 = vmul.f32 %v1931_v3, %v2207_v26  ;;  %v1382_v13 = vadd.f32 %v1254_v59, %v1126_v57  ;;  %v1266_v57 = vmul.f32 %v1952_v56, %v2205_v25  ;;  %v1953_v59 = vld [vmem:[#allocation5 + $0x3a0] sm:$0xff]  ;;  %v1956_v3 = vld [vmem:[#allocation7 + $0x3a8] sm:$0xff] }
 0x152   :  { %1625 = vst [vmem:[#allocation9 + $0x2d0] sm:$0xff] %v1369_v9  ;;  %v1129_v9 = vmul.f32 %v1933_v8, %v2207_v26  ;;  %v1383_v18 = vadd.f32 %v1255_v0, %v1127_v62  ;;  %v1267_v62 = vmul.f32 %v1954_v61, %v2205_v25  ;;  %v1955_v0 = vld [vmem:[#allocation5 + $0x3a8] sm:$0xff]  ;;  %v1958_v8 = vld [vmem:[#allocation7 + $0x3b0] sm:$0xff] }
 0x153   :  { %1626 = vst [vmem:[#allocation9 + $0x2d8] sm:$0xff] %v1370_v15  ;;  %v1130_v15 = vmul.f32 %v1935_v14, %v2207_v26  ;;  %v1384_v23 = vadd.f32 %v1256_v6, %v1128_v5  ;;  %v1268_v5 = vmul.f32 %v1956_v3, %v2205_v25  ;;  %v1957_v6 = vld [vmem:[#allocation5 + $0x3b0] sm:$0xff]  ;;  %v1960_v14 = vld [vmem:[#allocation7 + $0x3b8] sm:$0xff] }
 0x154   :  { %1627 = vst [vmem:[#allocation9 + $0x2e0] sm:$0xff] %v1371_v20  ;;  %v1131_v20 = vmul.f32 %v1937_v19, %v2207_v26  ;;  %v1385_v31 = vadd.f32 %v1257_v12, %v1129_v9  ;;  %v1269_v9 = vmul.f32 %v1958_v8, %v2205_v25  ;;  %v1959_v12 = vld [vmem:[#allocation5 + $0x3b8] sm:$0xff]  ;;  %v1962_v19 = vld [vmem:[#allocation7 + $0x3c0] sm:$0xff] }
 0x155   :  { %1628 = vst [vmem:[#allocation9 + $0x2e8] sm:$0xff] %v1372_v27  ;;  %v1132_v27 = vmul.f32 %v1939_v24, %v2207_v26  ;;  %v1386_v35 = vadd.f32 %v1258_v17, %v1130_v15  ;;  %v1270_v15 = vmul.f32 %v1960_v14, %v2205_v25  ;;  %v1961_v17 = vld [vmem:[#allocation5 + $0x3c0] sm:$0xff]  ;;  %v1964_v24 = vld [vmem:[#allocation7 + $0x3c8] sm:$0xff] }
 0x156   :  { %1629 = vst [vmem:[#allocation9 + $0x2f0] sm:$0xff] %v1373_v32  ;;  %v1133_v32 = vmul.f32 %v1941_v1, %v2207_v26  ;;  %v1387_v39 = vadd.f32 %v1259_v22, %v1131_v20  ;;  %v1271_v20 = vmul.f32 %v1962_v19, %v2205_v25  ;;  %v1963_v22 = vld [vmem:[#allocation5 + $0x3c8] sm:$0xff]  ;;  %v1966_v1 = vld [vmem:[#allocation7 + $0x3d0] sm:$0xff] }
 0x157   :  { %1630 = vst [vmem:[#allocation9 + $0x2f8] sm:$0xff] %v1374_v37  ;;  %v1134_v37 = vmul.f32 %v1943_v36, %v2207_v26  ;;  %v1388_v43 = vadd.f32 %v1260_v30, %v1132_v27  ;;  %v1272_v27 = vmul.f32 %v1964_v24, %v2205_v25  ;;  %v1965_v30 = vld [vmem:[#allocation5 + $0x3d0] sm:$0xff]  ;;  %v1968_v36 = vld [vmem:[#allocation7 + $0x3d8] sm:$0xff] }
 0x158   :  { %1631 = vst [vmem:[#allocation9 + $0x300] sm:$0xff] %v1375_v41  ;;  %v1135_v41 = vmul.f32 %v1945_v40, %v2207_v26  ;;  %v1389_v48 = vadd.f32 %v1261_v34, %v1133_v32  ;;  %v1273_v32 = vmul.f32 %v1966_v1, %v2205_v25  ;;  %v1967_v34 = vld [vmem:[#allocation5 + $0x3d8] sm:$0xff]  ;;  %v1970_v40 = vld [vmem:[#allocation7 + $0x3e0] sm:$0xff] }
 0x159   :  { %1632 = vst [vmem:[#allocation9 + $0x308] sm:$0xff] %v1376_v45  ;;  %v1136_v45 = vmul.f32 %v1947_v44, %v2207_v26  ;;  %v1390_v53 = vadd.f32 %v1262_v38, %v1134_v37  ;;  %v1274_v37 = vmul.f32 %v1968_v36, %v2205_v25  ;;  %v1969_v38 = vld [vmem:[#allocation5 + $0x3e0] sm:$0xff]  ;;  %v1972_v44 = vld [vmem:[#allocation7 + $0x3e8] sm:$0xff] }
 0x15a   :  { %1633 = vst [vmem:[#allocation9 + $0x310] sm:$0xff] %v1377_v50  ;;  %v1137_v50 = vmul.f32 %v1949_v49, %v2207_v26  ;;  %v1391_v58 = vadd.f32 %v1263_v42, %v1135_v41  ;;  %v1275_v41 = vmul.f32 %v1970_v40, %v2205_v25  ;;  %v1971_v42 = vld [vmem:[#allocation5 + $0x3e8] sm:$0xff]  ;;  %v1974_v49 = vld [vmem:[#allocation7 + $0x3f0] sm:$0xff] }
 0x15b   :  { %1634 = vst [vmem:[#allocation9 + $0x318] sm:$0xff] %v1378_v55  ;;  %v1138_v55 = vmul.f32 %v1951_v54, %v2207_v26  ;;  %v1392_v63 = vadd.f32 %v1264_v47, %v1136_v45  ;;  %v1276_v45 = vmul.f32 %v1972_v44, %v2205_v25  ;;  %v1973_v47 = vld [vmem:[#allocation5 + $0x3f0] sm:$0xff]  ;;  %v1976_v54 = vld [vmem:[#allocation7 + $0x3f8] sm:$0xff] }
 0x15c   :  { %1635 = vst [vmem:[#allocation9 + $0x320] sm:$0xff] %v1379_v60  ;;  %v1139_v60 = vmul.f32 %v1953_v59, %v2207_v26  ;;  %v1393_v4 = vadd.f32 %v1265_v52, %v1137_v50  ;;  %v1277_v50 = vmul.f32 %v1974_v49, %v2205_v25  ;;  %v1975_v52 = vld [vmem:[#allocation5 + $0x3f8] sm:$0xff] }
 0x15d   :  { %1636 = vst [vmem:[#allocation9 + $0x328] sm:$0xff] %v1380_v2  ;;  %v1140_v2 = vmul.f32 %v1955_v0, %v2207_v26  ;;  %v1394_v10 = vadd.f32 %v1266_v57, %v1138_v55  ;;  %v1278_v55 = vmul.f32 %v1976_v54, %v2205_v25 }
 0x15e   :  { %1637 = vst [vmem:[#allocation9 + $0x330] sm:$0xff] %v1381_v7  ;;  %v1141_v7 = vmul.f32 %v1957_v6, %v2207_v26  ;;  %v1395_v16 = vadd.f32 %v1267_v62, %v1139_v60 }
 0x15f   :  { %1638 = vst [vmem:[#allocation9 + $0x338] sm:$0xff] %v1382_v13  ;;  %v1142_v13 = vmul.f32 %v1959_v12, %v2207_v26  ;;  %v1396_v21 = vadd.f32 %v1268_v5, %v1140_v2 }
 0x160   :  { %1639 = vst [vmem:[#allocation9 + $0x340] sm:$0xff] %v1383_v18  ;;  %v1143_v18 = vmul.f32 %v1961_v17, %v2207_v26  ;;  %v1397_v28 = vadd.f32 %v1269_v9, %v1141_v7 }
 0x161   :  { %1640 = vst [vmem:[#allocation9 + $0x348] sm:$0xff] %v1384_v23  ;;  %v1144_v23 = vmul.f32 %v1963_v22, %v2207_v26  ;;  %v1398_v33 = vadd.f32 %v1270_v15, %v1142_v13 }
 0x162   :  { %1641 = vst [vmem:[#allocation9 + $0x350] sm:$0xff] %v1385_v31  ;;  %v1145_v31 = vmul.f32 %v1965_v30, %v2207_v26  ;;  %v1399_v11 = vadd.f32 %v1271_v20, %v1143_v18 }
 0x163   :  { %1642 = vst [vmem:[#allocation9 + $0x358] sm:$0xff] %v1386_v35  ;;  %v1146_v35 = vmul.f32 %v1967_v34, %v2207_v26  ;;  %v1400_v29 = vadd.f32 %v1272_v27, %v1144_v23 }
 0x164   :  { %1643 = vst [vmem:[#allocation9 + $0x360] sm:$0xff] %v1387_v39  ;;  %v1147_v39 = vmul.f32 %v1969_v38, %v2207_v26  ;;  %v1401_v46 = vadd.f32 %v1273_v32, %v1145_v31 }
 0x165   :  { %1644 = vst [vmem:[#allocation9 + $0x368] sm:$0xff] %v1388_v43  ;;  %v1148_v43 = vmul.f32 %v1971_v42, %v2207_v26  ;;  %v1402_v51 = vadd.f32 %v1274_v37, %v1146_v35 }
 0x166   :  { %1645 = vst [vmem:[#allocation9 + $0x370] sm:$0xff] %v1389_v48  ;;  %v1149_v48 = vmul.f32 %v1973_v47, %v2207_v26  ;;  %v1403_v56 = vadd.f32 %v1275_v41, %v1147_v39 }
 0x167   :  { %1646 = vst [vmem:[#allocation9 + $0x378] sm:$0xff] %v1390_v53  ;;  %v1150_v53 = vmul.f32 %v1975_v52, %v2207_v26  ;;  %v1404_v57 = vadd.f32 %v1276_v45, %v1148_v43 }
 0x168   :  { %1647 = vst [vmem:[#allocation9 + $0x380] sm:$0xff] %v1391_v58  ;;  %v1405_v58 = vadd.f32 %v1277_v50, %v1149_v48 }
 0x169   :  { %1648 = vst [vmem:[#allocation9 + $0x388] sm:$0xff] %v1392_v63  ;;  %v1406_v59 = vadd.f32 %v1278_v55, %v1150_v53 }
 0x16a   :  { %1649 = vst [vmem:[#allocation9 + $0x390] sm:$0xff] %v1393_v4 }
 0x16b   :  { %1650 = vst [vmem:[#allocation9 + $0x398] sm:$0xff] %v1394_v10 }
 0x16c   :  { %1651 = vst [vmem:[#allocation9 + $0x3a0] sm:$0xff] %v1395_v16 }
 0x16d   :  { %1652 = vst [vmem:[#allocation9 + $0x3a8] sm:$0xff] %v1396_v21 }
 0x16e   :  { %1653 = vst [vmem:[#allocation9 + $0x3b0] sm:$0xff] %v1397_v28 }
 0x16f   :  { %1654 = vst [vmem:[#allocation9 + $0x3b8] sm:$0xff] %v1398_v33 }
 0x170   :  { %1655 = vst [vmem:[#allocation9 + $0x3c0] sm:$0xff] %v1399_v11 }
 0x171   :  { %1656 = vst [vmem:[#allocation9 + $0x3c8] sm:$0xff] %v1400_v29 }
 0x172   :  { %1657 = vst [vmem:[#allocation9 + $0x3d0] sm:$0xff] %v1401_v46 }
 0x173   :  { %1658 = vst [vmem:[#allocation9 + $0x3d8] sm:$0xff] %v1402_v51 }
 0x174   :  { %1659 = vst [vmem:[#allocation9 + $0x3e0] sm:$0xff] %v1403_v56 }
 0x175   :  { %1660 = vst [vmem:[#allocation9 + $0x3e8] sm:$0xff] %v1404_v57 }
 0x176   :  { %1661 = vst [vmem:[#allocation9 + $0x3f0] sm:$0xff] %v1405_v58 }
 0x177   :  { %1662 = vst [vmem:[#allocation9 + $0x3f8] sm:$0xff] %v1406_v59 }
 0x178   :  { %1688 = dma.vmem_to_hbm [thread:$0]  %s1681_s8, 16384, %s1683_s11, [#allocation10], %s2106_s23, %s2106_s23, %s2107_s24  }
 0x179   :  { %2101 = dma.done.wait [#allocation4], 16384  }
 0x17a   :  { %2102 = vsyncadd [#allocation4], 4294950912 }
 0x17b   :  { %2103 = dma.done.wait [#allocation10], 16384  }
 0x17c   :  { %2104 = vsyncadd [#allocation10], 4294950912 }
 0x17d   :  { %1697 = vsyncpa [#allocation3], 1 }
 0x17e   :  { %1698 = vsyncpa [#allocation6], 1 }
 0x17f   :  { %1699 = vsyncpa [#allocation4], 1 }
 0x180   :  { %1700 = vsyncpa [#allocation10], 1 }

</bundles_post_ra>
